<compile_context>
chip_gen: v7x
topology: tpu7x:2x2x1
jax: 0.10.0
libtpu: 0.0.40
codegen_flags: <defaults>
</compile_context>

<pallas_src>
import functools

import jax
import jax.numpy as jnp
from jax.experimental import pallas as pl
from jax.experimental.pallas import tpu as pltpu


# ---------------------------------------------------------------------------
# Kernel
# ---------------------------------------------------------------------------
def _block_kernel(x_ref, w1_ref, w2_ref, ws_ref, aux_ref, mask_ref, o_ref,
                  *, shifts, eps):
    """Fused conv1->LN->GELU->conv2->LN (+1x1 shortcut) ->GELU.

    x_ref    : (Cin,  L)          channel-major, lanes = nb images * H*W
    w1_ref   : (K*K, Cout, Cin)   per-tap conv1 weights
    w2_ref   : (K*K, Cout, Cout)  per-tap conv2 weights
    ws_ref   : (Cout, Cin)        1x1 shortcut weights
    aux_ref  : (Cout, 7)          [b1, g1, bt1, b2, g2, bt2, bs]
    mask_ref : (K*K, 1, L)        f32 boundary masks (0 outside image / tap)
    o_ref    : (Cout, L)
    """
    x = x_ref[...]                                    # (Cin, L)
    KK = len(shifts)

    b1, g1, bt1 = aux_ref[:, 0:1], aux_ref[:, 1:2], aux_ref[:, 2:3]
    b2, g2, bt2 = aux_ref[:, 3:4], aux_ref[:, 4:5], aux_ref[:, 5:6]
    bs = aux_ref[:, 6:7]

    # Hoist mask rows once; reused by both convolutions (no per-conv rebuild).
    mrows = [mask_ref[t] if shifts[t] else None for t in range(KK)]

    def conv_same(inp, w_ref, bias):
        # K*K small matmuls accumulated in f32 -- no im2col materialization.
        acc = None
        for t in range(KK):
            sh = shifts[t]
            if sh:
                piece = pltpu.roll(inp, sh, 1) * mrows[t]   # XLU roll + 1 vmul
            else:
                piece = inp                                  # center tap
            part = jnp.dot(w_ref[t], piece, preferred_element_type=jnp.float32)
            acc = part if acc is None else acc + part
        return acc + bias

    def layer_norm(y, g, b):
        # LayerNorm over the channel (sublane) axis at every spatial location.
        mean = jnp.mean(y, axis=0, keepdims=True)
        var = jnp.mean(jnp.square(y - mean), axis=0, keepdims=True)
        return (y - mean) * jax.lax.rsqrt(var + eps) * g + b

    def gelu(v):  # nn.GELU() default (erf-based)
        return 0.5 * v * (1.0 + jax.lax.erf(v * 0.7071067811865476))

    y = gelu(layer_norm(conv_same(x, w1_ref, b1), g1, bt1))          # conv1
    y = layer_norm(conv_same(y, w2_ref, b2), g2, bt2)                # conv2
    sc = jnp.dot(ws_ref[...], x, preferred_element_type=jnp.float32) + bs
    o_ref[...] = gelu(y + sc)


# ---------------------------------------------------------------------------
# Wrapper helpers
# ---------------------------------------------------------------------------
def _tap_shifts(W, K, pad, L):
    """Lane-roll amount per (kh, kw) tap for a 'same' KxK conv."""
    return tuple(
        (-((kh - pad) * W + (kw - pad))) % L
        for kh in range(K) for kw in range(K)
    )


def _build_tap_masks(H, W, nb, K, pad):
    """(K*K, 1, nb*H*W) f32 masks using PER-IMAGE coordinates.

    Zeroes taps that fall outside the image, which also guarantees no bleed
    across the `nb` images packed into the same lane block (a shifted
    position that stays inside [0,H)x[0,W) stays inside its own image).
    """
    M = H * W
    L = nb * M
    q = jnp.arange(L, dtype=jnp.int32) % M
    hh = q // W
    ww = q % W
    rows = []
    for kh in range(K):
        for kw in range(K):
            dh, dw = kh - pad, kw - pad
            ok = ((hh + dh >= 0) & (hh + dh < H) &
                  (ww + dw >= 0) & (ww + dw < W))
            rows.append(ok.astype(jnp.float32))
    return jnp.stack(rows, axis=0).reshape(K * K, 1, L)


def prepare_params(w1, b1, g1, bt1, w2, b2, g2, bt2, ws, bs):
    """Convert PyTorch-layout parameters to the fused-kernel layout."""
    Cout, Cin, K, _ = w1.shape
    # Per-tap weight blocks: tap t = kh*K + kw -> (Cout, Cin).
    w1t = jnp.transpose(w1, (2, 3, 0, 1)).reshape(K * K, Cout, Cin)
    w2t = jnp.transpose(w2, (2, 3, 0, 1)).reshape(K * K, Cout, w2.shape[1])
    wsf = ws[:, :, 0, 0]                                         # (Cout, Cin)
    aux = jnp.stack([b1, g1, bt1, b2, g2, bt2, bs], axis=1)      # (Cout, 7)
    return dict(w1t=w1t, w2t=w2t, wsf=wsf, aux=aux)


def grid_feature_conv2d_block(x_nchw, params, *, kernel_size, lane_target=512):
    """Forward of GridFeatureConv2dBlock (stride=1, no up_stride, in != out).

    x_nchw: (N, Cin*csd, H, W) float32 -- the PyTorch Conv2d input layout.
    Returns (N, Cout*csd, H, W) float32.
    """
    N, Cin, H, W = x_nchw.shape
    K = kernel_size
    pad = (K - 1) // 2
    Cout = params["wsf"].shape[0]
    M = H * W

    # Images per grid step: fold batch into the lane axis until each step has
    # >= lane_target lanes (fewer, fatter steps).  `nb` must divide N so every
    # step reuses the same precomputed mask.  For larger N this keeps a
    # multi-step "parallel" grid (v7x megacore split preserved).
    nb = min(N, max(1, lane_target // M))
    while N % nb:
        nb -= 1
    G = N // nb
    L = nb * M

    # Channel-major layout with lanes = N*H*W (cheap wrapper-side relayout).
    x_cm = jnp.transpose(x_nchw.reshape(N, Cin, M), (1, 0, 2)).reshape(Cin, N * M)
    masks = _build_tap_masks(H, W, nb, K, pad)
    shifts = _tap_shifts(W, K, pad, L)

    out_cm = pl.pallas_call(
        functools.partial(_block_kernel, shifts=shifts, eps=1e-5),
        out_shape=jax.ShapeDtypeStruct((Cout, N * M), jnp.float32),
        grid=(G,),
        in_specs=[
            pl.BlockSpec((Cin, L), lambda g: (0, g)),
            pl.BlockSpec((K * K, Cout, Cin), lambda g: (0, 0, 0)),
            pl.BlockSpec((K * K, Cout, Cout), lambda g: (0, 0, 0)),
            pl.BlockSpec((Cout, Cin), lambda g: (0, 0)),
            pl.BlockSpec((Cout, 7), lambda g: (0, 0)),
            pl.BlockSpec((K * K, 1, L), lambda g: (0, 0, 0)),
        ],
        out_specs=pl.BlockSpec((Cout, L), lambda g: (0, g)),
        compiler_params=pltpu.CompilerParams(dimension_semantics=("parallel",)),
    )(x_cm, params["w1t"], params["w2t"], params["wsf"], params["aux"], masks)

    return jnp.transpose(out_cm.reshape(Cout, N, M), (1, 0, 2)).reshape(N, Cout, H, W)


# ---------------------------------------------------------------------------
# Pure-JAX reference (mirrors the PyTorch forward, NCHW) for verification.
# ---------------------------------------------------------------------------
def reference(x, p, *, kernel_size):
    pad = (kernel_size - 1) // 2

    def conv(a, w, b, padk):
        y = jax.lax.conv_general_dilated(
            a, w, (1, 1), ((padk, padk), (padk, padk)),
            dimension_numbers=("NCHW", "OIHW", "NCHW"))
        return y + b.reshape(1, -1, 1, 1)

    def ln(a, g, bt):
        m = jnp.mean(a, axis=1, keepdims=True)
        v = jnp.mean(jnp.square(a - m), axis=1, keepdims=True)
        return ((a - m) / jnp.sqrt(v + 1e-5) * g.reshape(1, -1, 1, 1)
                + bt.reshape(1, -1, 1, 1))

    gelu = lambda a: jax.nn.gelu(a, approximate=False)

    y = gelu(ln(conv(x, p["w1"], p["b1"], pad), p["g1"], p["bt1"]))
    y = ln(conv(y, p["w2"], p["b2"], pad), p["g2"], p["bt2"])
    sc = conv(x, p["ws"], p["bs"], 0)
    return gelu(y + sc)


if __name__ == "__main__":
    # Module config
    in_channels, out_channels = 4, 8
    kernel_size, csd = 3, 2
    N, H, W = 2, 16, 16
    Cin = in_channels * csd      # 8
    Cout = out_channels * csd    # 16

    key = jax.random.PRNGKey(0)
    ks = jax.random.split(key, 11)

    # Deterministic synthetic parameters in PyTorch layouts.
    w1 = jax.random.normal(ks[0], (Cout, Cin, kernel_size, kernel_size), jnp.float32) * 0.1
    b1 = jax.random.normal(ks[1], (Cout,), jnp.float32) * 0.1
    w2 = jax.random.normal(ks[2], (Cout, Cout, kernel_size, kernel_size), jnp.float32) * 0.1
    b2 = jax.random.normal(ks[3], (Cout,), jnp.float32) * 0.1
    ws = jax.random.normal(ks[4], (Cout, Cin, 1, 1), jnp.float32) * 0.1
    bs = jax.random.normal(ks[5], (Cout,), jnp.float32) * 0.1
    g1 = 1.0 + 0.1 * jax.random.normal(ks[6], (Cout,), jnp.float32)
    bt1 = 0.1 * jax.random.normal(ks[7], (Cout,), jnp.float32)
    g2 = 1.0 + 0.1 * jax.random.normal(ks[8], (Cout,), jnp.float32)
    bt2 = 0.1 * jax.random.normal(ks[9], (Cout,), jnp.float32)

    # Input in the PyTorch Conv2d layout [N, Cin*csd, H, W].
    x_nchw = jax.random.normal(ks[10], (N, Cin, H, W), jnp.float32)

    kparams = prepare_params(w1, b1, g1, bt1, w2, b2, g2, bt2, ws, bs)
    out = grid_feature_conv2d_block(x_nchw, kparams, kernel_size=kernel_size)
    out = jax.block_until_ready(out)

    ref = reference(
        x_nchw,
        dict(w1=w1, b1=b1, g1=g1, bt1=bt1, w2=w2, b2=b2, g2=g2, bt2=bt2,
             ws=ws, bs=bs),
        kernel_size=kernel_size)

    assert out.shape == (N, Cout, H, W)
    err = jnp.max(jnp.abs(out - ref))
    assert jnp.allclose(out, ref, atol=1e-4, rtol=1e-4), f"max abs err {err}"

    print("KERNEL_OK")
</pallas_src>

<mosaic_0001>
module attributes {stable_mosaic.version = 11 : i64} {
  func.func @_block_kernel(%arg0: i32, %arg1: memref<8x512xf32, #tpu.memory_space<vmem>>, %arg2: memref<9x16x8xf32, #tpu.memory_space<vmem>>, %arg3: memref<9x16x16xf32, #tpu.memory_space<vmem>>, %arg4: memref<16x8xf32, #tpu.memory_space<vmem>>, %arg5: memref<16x7xf32, #tpu.memory_space<vmem>>, %arg6: memref<9x1x512xf32, #tpu.memory_space<vmem>>, %arg7: memref<16x512xf32, #tpu.memory_space<vmem>>) attributes {dimension_semantics = [#tpu.dimension_semantics<parallel>], iteration_bounds = array<i64: 1>, scalar_prefetch = 0 : i64, scratch_operands = 0 : i64, tpu.core_type = #tpu.core_type<tc>, window_params = [{transform_indices = @transform_0, window_bounds = array<i64: 8, 512>}, {pipeline_mode = #tpu.pipeline_mode<synchronous>, transform_indices = @transform_1, window_bounds = array<i64: 9, 16, 8>}, {pipeline_mode = #tpu.pipeline_mode<synchronous>, transform_indices = @transform_2, window_bounds = array<i64: 9, 16, 16>}, {pipeline_mode = #tpu.pipeline_mode<synchronous>, transform_indices = @transform_3, window_bounds = array<i64: 16, 8>}, {pipeline_mode = #tpu.pipeline_mode<synchronous>, transform_indices = @transform_4, window_bounds = array<i64: 16, 7>}, {pipeline_mode = #tpu.pipeline_mode<synchronous>, transform_indices = @transform_5, window_bounds = array<i64: 9, 1, 512>}, {transform_indices = @transform_6, window_bounds = array<i64: 16, 512>}]} {
    %c0 = arith.constant 0 : index
    %c0_0 = arith.constant 0 : index
    %0 = vector.load %arg1[%c0, %c0_0] : memref<8x512xf32, #tpu.memory_space<vmem>>, vector<8x512xf32>
    %c0_1 = arith.constant 0 : index
    %c0_2 = arith.constant 0 : index
    %1 = vector.load %arg5[%c0_1, %c0_2] : memref<16x7xf32, #tpu.memory_space<vmem>>, vector<16x1xf32>
    %c0_3 = arith.constant 0 : index
    %c1 = arith.constant 1 : index
    %2 = vector.load %arg5[%c0_3, %c1] : memref<16x7xf32, #tpu.memory_space<vmem>>, vector<16x1xf32>
    %c0_4 = arith.constant 0 : index
    %c2 = arith.constant 2 : index
    %3 = vector.load %arg5[%c0_4, %c2] : memref<16x7xf32, #tpu.memory_space<vmem>>, vector<16x1xf32>
    %c0_5 = arith.constant 0 : index
    %c3 = arith.constant 3 : index
    %4 = vector.load %arg5[%c0_5, %c3] : memref<16x7xf32, #tpu.memory_space<vmem>>, vector<16x1xf32>
    %c0_6 = arith.constant 0 : index
    %c4 = arith.constant 4 : index
    %5 = vector.load %arg5[%c0_6, %c4] : memref<16x7xf32, #tpu.memory_space<vmem>>, vector<16x1xf32>
    %c0_7 = arith.constant 0 : index
    %c5 = arith.constant 5 : index
    %6 = vector.load %arg5[%c0_7, %c5] : memref<16x7xf32, #tpu.memory_space<vmem>>, vector<16x1xf32>
    %c0_8 = arith.constant 0 : index
    %c6 = arith.constant 6 : index
    %7 = vector.load %arg5[%c0_8, %c6] : memref<16x7xf32, #tpu.memory_space<vmem>>, vector<16x1xf32>
    %c0_9 = arith.constant 0 : index
    %c0_10 = arith.constant 0 : index
    %c0_11 = arith.constant 0 : index
    %8 = vector.load %arg6[%c0_9, %c0_10, %c0_11] : memref<9x1x512xf32, #tpu.memory_space<vmem>>, vector<1x1x512xf32>
    %9 = vector.shape_cast %8 : vector<1x1x512xf32> to vector<1x512xf32>
    %c1_12 = arith.constant 1 : index
    %c0_13 = arith.constant 0 : index
    %c0_14 = arith.constant 0 : index
    %10 = vector.load %arg6[%c1_12, %c0_13, %c0_14] : memref<9x1x512xf32, #tpu.memory_space<vmem>>, vector<1x1x512xf32>
    %11 = vector.shape_cast %10 : vector<1x1x512xf32> to vector<1x512xf32>
    %c2_15 = arith.constant 2 : index
    %c0_16 = arith.constant 0 : index
    %c0_17 = arith.constant 0 : index
    %12 = vector.load %arg6[%c2_15, %c0_16, %c0_17] : memref<9x1x512xf32, #tpu.memory_space<vmem>>, vector<1x1x512xf32>
    %13 = vector.shape_cast %12 : vector<1x1x512xf32> to vector<1x512xf32>
    %c3_18 = arith.constant 3 : index
    %c0_19 = arith.constant 0 : index
    %c0_20 = arith.constant 0 : index
    %14 = vector.load %arg6[%c3_18, %c0_19, %c0_20] : memref<9x1x512xf32, #tpu.memory_space<vmem>>, vector<1x1x512xf32>
    %15 = vector.shape_cast %14 : vector<1x1x512xf32> to vector<1x512xf32>
    %c5_21 = arith.constant 5 : index
    %c0_22 = arith.constant 0 : index
    %c0_23 = arith.constant 0 : index
    %16 = vector.load %arg6[%c5_21, %c0_22, %c0_23] : memref<9x1x512xf32, #tpu.memory_space<vmem>>, vector<1x1x512xf32>
    %17 = vector.shape_cast %16 : vector<1x1x512xf32> to vector<1x512xf32>
    %c6_24 = arith.constant 6 : index
    %c0_25 = arith.constant 0 : index
    %c0_26 = arith.constant 0 : index
    %18 = vector.load %arg6[%c6_24, %c0_25, %c0_26] : memref<9x1x512xf32, #tpu.memory_space<vmem>>, vector<1x1x512xf32>
    %19 = vector.shape_cast %18 : vector<1x1x512xf32> to vector<1x512xf32>
    %c7 = arith.constant 7 : index
    %c0_27 = arith.constant 0 : index
    %c0_28 = arith.constant 0 : index
    %20 = vector.load %arg6[%c7, %c0_27, %c0_28] : memref<9x1x512xf32, #tpu.memory_space<vmem>>, vector<1x1x512xf32>
    %21 = vector.shape_cast %20 : vector<1x1x512xf32> to vector<1x512xf32>
    %c8 = arith.constant 8 : index
    %c0_29 = arith.constant 0 : index
    %c0_30 = arith.constant 0 : index
    %22 = vector.load %arg6[%c8, %c0_29, %c0_30] : memref<9x1x512xf32, #tpu.memory_space<vmem>>, vector<1x1x512xf32>
    %23 = vector.shape_cast %22 : vector<1x1x512xf32> to vector<1x512xf32>
    %c17_i32 = arith.constant 17 : i32
    %24 = tpu.dynamic_rotate %0 by %c17_i32 dim 1 : vector<8x512xf32>, i32 -> vector<8x512xf32>
    %25 = vector.broadcast %9 : vector<1x512xf32> to vector<8x512xf32>
    %26 = arith.mulf %24, %25 : vector<8x512xf32>
    %c0_31 = arith.constant 0 : index
    %c0_32 = arith.constant 0 : index
    %c0_33 = arith.constant 0 : index
    %27 = vector.load %arg2[%c0_31, %c0_32, %c0_33] : memref<9x16x8xf32, #tpu.memory_space<vmem>>, vector<1x16x8xf32>
    %28 = vector.shape_cast %27 : vector<1x16x8xf32> to vector<16x8xf32>
    %cst = arith.constant dense<0.000000e+00> : vector<16x512xf32>
    %29 = tpu.matmul %28, %26, %cst {dimension_numbers = #tpu.dot_dimension_numbers<[1], [0], [0], [1], [0, 0, 1, 1], [], []>} : vector<16x8xf32>, vector<8x512xf32>, vector<16x512xf32> -> vector<16x512xf32>
    %c16_i32 = arith.constant 16 : i32
    %30 = tpu.dynamic_rotate %0 by %c16_i32 dim 1 : vector<8x512xf32>, i32 -> vector<8x512xf32>
    %31 = vector.broadcast %11 : vector<1x512xf32> to vector<8x512xf32>
    %32 = arith.mulf %30, %31 : vector<8x512xf32>
    %c1_34 = arith.constant 1 : index
    %c0_35 = arith.constant 0 : index
    %c0_36 = arith.constant 0 : index
    %33 = vector.load %arg2[%c1_34, %c0_35, %c0_36] : memref<9x16x8xf32, #tpu.memory_space<vmem>>, vector<1x16x8xf32>
    %34 = vector.shape_cast %33 : vector<1x16x8xf32> to vector<16x8xf32>
    %cst_37 = arith.constant dense<0.000000e+00> : vector<16x512xf32>
    %35 = tpu.matmul %34, %32, %cst_37 {dimension_numbers = #tpu.dot_dimension_numbers<[1], [0], [0], [1], [0, 0, 1, 1], [], []>} : vector<16x8xf32>, vector<8x512xf32>, vector<16x512xf32> -> vector<16x512xf32>
    %36 = arith.addf %29, %35 : vector<16x512xf32>
    %c15_i32 = arith.constant 15 : i32
    %37 = tpu.dynamic_rotate %0 by %c15_i32 dim 1 : vector<8x512xf32>, i32 -> vector<8x512xf32>
    %38 = vector.broadcast %13 : vector<1x512xf32> to vector<8x512xf32>
    %39 = arith.mulf %37, %38 : vector<8x512xf32>
    %c2_38 = arith.constant 2 : index
    %c0_39 = arith.constant 0 : index
    %c0_40 = arith.constant 0 : index
    %40 = vector.load %arg2[%c2_38, %c0_39, %c0_40] : memref<9x16x8xf32, #tpu.memory_space<vmem>>, vector<1x16x8xf32>
    %41 = vector.shape_cast %40 : vector<1x16x8xf32> to vector<16x8xf32>
    %cst_41 = arith.constant dense<0.000000e+00> : vector<16x512xf32>
    %42 = tpu.matmul %41, %39, %cst_41 {dimension_numbers = #tpu.dot_dimension_numbers<[1], [0], [0], [1], [0, 0, 1, 1], [], []>} : vector<16x8xf32>, vector<8x512xf32>, vector<16x512xf32> -> vector<16x512xf32>
    %43 = arith.addf %36, %42 : vector<16x512xf32>
    %c1_i32 = arith.constant 1 : i32
    %44 = tpu.dynamic_rotate %0 by %c1_i32 dim 1 : vector<8x512xf32>, i32 -> vector<8x512xf32>
    %45 = vector.broadcast %15 : vector<1x512xf32> to vector<8x512xf32>
    %46 = arith.mulf %44, %45 : vector<8x512xf32>
    %c3_42 = arith.constant 3 : index
    %c0_43 = arith.constant 0 : index
    %c0_44 = arith.constant 0 : index
    %47 = vector.load %arg2[%c3_42, %c0_43, %c0_44] : memref<9x16x8xf32, #tpu.memory_space<vmem>>, vector<1x16x8xf32>
    %48 = vector.shape_cast %47 : vector<1x16x8xf32> to vector<16x8xf32>
    %cst_45 = arith.constant dense<0.000000e+00> : vector<16x512xf32>
    %49 = tpu.matmul %48, %46, %cst_45 {dimension_numbers = #tpu.dot_dimension_numbers<[1], [0], [0], [1], [0, 0, 1, 1], [], []>} : vector<16x8xf32>, vector<8x512xf32>, vector<16x512xf32> -> vector<16x512xf32>
    %50 = arith.addf %43, %49 : vector<16x512xf32>
    %c4_46 = arith.constant 4 : index
    %c0_47 = arith.constant 0 : index
    %c0_48 = arith.constant 0 : index
    %51 = vector.load %arg2[%c4_46, %c0_47, %c0_48] : memref<9x16x8xf32, #tpu.memory_space<vmem>>, vector<1x16x8xf32>
    %52 = vector.shape_cast %51 : vector<1x16x8xf32> to vector<16x8xf32>
    %cst_49 = arith.constant dense<0.000000e+00> : vector<16x512xf32>
    %53 = tpu.matmul %52, %0, %cst_49 {dimension_numbers = #tpu.dot_dimension_numbers<[1], [0], [0], [1], [0, 0, 1, 1], [], []>} : vector<16x8xf32>, vector<8x512xf32>, vector<16x512xf32> -> vector<16x512xf32>
    %54 = arith.addf %50, %53 : vector<16x512xf32>
    %c511_i32 = arith.constant 511 : i32
    %55 = tpu.dynamic_rotate %0 by %c511_i32 dim 1 : vector<8x512xf32>, i32 -> vector<8x512xf32>
    %56 = vector.broadcast %17 : vector<1x512xf32> to vector<8x512xf32>
    %57 = arith.mulf %55, %56 : vector<8x512xf32>
    %c5_50 = arith.constant 5 : index
    %c0_51 = arith.constant 0 : index
    %c0_52 = arith.constant 0 : index
    %58 = vector.load %arg2[%c5_50, %c0_51, %c0_52] : memref<9x16x8xf32, #tpu.memory_space<vmem>>, vector<1x16x8xf32>
    %59 = vector.shape_cast %58 : vector<1x16x8xf32> to vector<16x8xf32>
    %cst_53 = arith.constant dense<0.000000e+00> : vector<16x512xf32>
    %60 = tpu.matmul %59, %57, %cst_53 {dimension_numbers = #tpu.dot_dimension_numbers<[1], [0], [0], [1], [0, 0, 1, 1], [], []>} : vector<16x8xf32>, vector<8x512xf32>, vector<16x512xf32> -> vector<16x512xf32>
    %61 = arith.addf %54, %60 : vector<16x512xf32>
    %c497_i32 = arith.constant 497 : i32
    %62 = tpu.dynamic_rotate %0 by %c497_i32 dim 1 : vector<8x512xf32>, i32 -> vector<8x512xf32>
    %63 = vector.broadcast %19 : vector<1x512xf32> to vector<8x512xf32>
    %64 = arith.mulf %62, %63 : vector<8x512xf32>
    %c6_54 = arith.constant 6 : index
    %c0_55 = arith.constant 0 : index
    %c0_56 = arith.constant 0 : index
    %65 = vector.load %arg2[%c6_54, %c0_55, %c0_56] : memref<9x16x8xf32, #tpu.memory_space<vmem>>, vector<1x16x8xf32>
    %66 = vector.shape_cast %65 : vector<1x16x8xf32> to vector<16x8xf32>
    %cst_57 = arith.constant dense<0.000000e+00> : vector<16x512xf32>
    %67 = tpu.matmul %66, %64, %cst_57 {dimension_numbers = #tpu.dot_dimension_numbers<[1], [0], [0], [1], [0, 0, 1, 1], [], []>} : vector<16x8xf32>, vector<8x512xf32>, vector<16x512xf32> -> vector<16x512xf32>
    %68 = arith.addf %61, %67 : vector<16x512xf32>
    %c496_i32 = arith.constant 496 : i32
    %69 = tpu.dynamic_rotate %0 by %c496_i32 dim 1 : vector<8x512xf32>, i32 -> vector<8x512xf32>
    %70 = vector.broadcast %21 : vector<1x512xf32> to vector<8x512xf32>
    %71 = arith.mulf %69, %70 : vector<8x512xf32>
    %c7_58 = arith.constant 7 : index
    %c0_59 = arith.constant 0 : index
    %c0_60 = arith.constant 0 : index
    %72 = vector.load %arg2[%c7_58, %c0_59, %c0_60] : memref<9x16x8xf32, #tpu.memory_space<vmem>>, vector<1x16x8xf32>
    %73 = vector.shape_cast %72 : vector<1x16x8xf32> to vector<16x8xf32>
    %cst_61 = arith.constant dense<0.000000e+00> : vector<16x512xf32>
    %74 = tpu.matmul %73, %71, %cst_61 {dimension_numbers = #tpu.dot_dimension_numbers<[1], [0], [0], [1], [0, 0, 1, 1], [], []>} : vector<16x8xf32>, vector<8x512xf32>, vector<16x512xf32> -> vector<16x512xf32>
    %75 = arith.addf %68, %74 : vector<16x512xf32>
    %c495_i32 = arith.constant 495 : i32
    %76 = tpu.dynamic_rotate %0 by %c495_i32 dim 1 : vector<8x512xf32>, i32 -> vector<8x512xf32>
    %77 = vector.broadcast %23 : vector<1x512xf32> to vector<8x512xf32>
    %78 = arith.mulf %76, %77 : vector<8x512xf32>
    %c8_62 = arith.constant 8 : index
    %c0_63 = arith.constant 0 : index
    %c0_64 = arith.constant 0 : index
    %79 = vector.load %arg2[%c8_62, %c0_63, %c0_64] : memref<9x16x8xf32, #tpu.memory_space<vmem>>, vector<1x16x8xf32>
    %80 = vector.shape_cast %79 : vector<1x16x8xf32> to vector<16x8xf32>
    %cst_65 = arith.constant dense<0.000000e+00> : vector<16x512xf32>
    %81 = tpu.matmul %80, %78, %cst_65 {dimension_numbers = #tpu.dot_dimension_numbers<[1], [0], [0], [1], [0, 0, 1, 1], [], []>} : vector<16x8xf32>, vector<8x512xf32>, vector<16x512xf32> -> vector<16x512xf32>
    %82 = arith.addf %75, %81 : vector<16x512xf32>
    %83 = vector.broadcast %1 : vector<16x1xf32> to vector<16x512xf32>
    %84 = arith.addf %82, %83 : vector<16x512xf32>
    %cst_66 = arith.constant dense<0.000000e+00> : vector<512xf32>
    %85 = vector.multi_reduction <add>, %84, %cst_66 [0] : vector<16x512xf32> to vector<512xf32>
    %86 = vector.shape_cast %85 : vector<512xf32> to vector<1x512xf32>
    %cst_67 = arith.constant 1.600000e+01 : f32
    %87 = vector.broadcast %cst_67 : f32 to vector<1x512xf32>
    %88 = arith.divf %86, %87 : vector<1x512xf32>
    %89 = vector.broadcast %88 : vector<1x512xf32> to vector<16x512xf32>
    %90 = arith.subf %84, %89 : vector<16x512xf32>
    %91 = arith.mulf %90, %90 : vector<16x512xf32>
    %cst_68 = arith.constant dense<0.000000e+00> : vector<512xf32>
    %92 = vector.multi_reduction <add>, %91, %cst_68 [0] : vector<16x512xf32> to vector<512xf32>
    %93 = vector.shape_cast %92 : vector<512xf32> to vector<1x512xf32>
    %cst_69 = arith.constant 1.600000e+01 : f32
    %94 = vector.broadcast %cst_69 : f32 to vector<1x512xf32>
    %95 = arith.divf %93, %94 : vector<1x512xf32>
    %96 = vector.broadcast %88 : vector<1x512xf32> to vector<16x512xf32>
    %97 = arith.subf %84, %96 : vector<16x512xf32>
    %cst_70 = arith.constant 9.99999974E-6 : f32
    %98 = vector.broadcast %cst_70 : f32 to vector<1x512xf32>
    %99 = arith.addf %95, %98 : vector<1x512xf32>
    %100 = math.rsqrt %99 : vector<1x512xf32>
    %101 = vector.broadcast %100 : vector<1x512xf32> to vector<16x512xf32>
    %102 = arith.mulf %97, %101 : vector<16x512xf32>
    %103 = vector.broadcast %2 : vector<16x1xf32> to vector<16x512xf32>
    %104 = arith.mulf %102, %103 : vector<16x512xf32>
    %105 = vector.broadcast %3 : vector<16x1xf32> to vector<16x512xf32>
    %106 = arith.addf %104, %105 : vector<16x512xf32>
    %cst_71 = arith.constant 5.000000e-01 : f32
    %107 = vector.broadcast %cst_71 : f32 to vector<16x512xf32>
    %108 = arith.mulf %107, %106 : vector<16x512xf32>
    %cst_72 = arith.constant 0.707106769 : f32
    %109 = vector.broadcast %cst_72 : f32 to vector<16x512xf32>
    %110 = arith.mulf %106, %109 : vector<16x512xf32>
    %111 = math.erf %110 : vector<16x512xf32>
    %cst_73 = arith.constant 1.000000e+00 : f32
    %112 = vector.broadcast %cst_73 : f32 to vector<16x512xf32>
    %113 = arith.addf %112, %111 : vector<16x512xf32>
    %114 = arith.mulf %108, %113 : vector<16x512xf32>
    %c17_i32_74 = arith.constant 17 : i32
    %115 = tpu.dynamic_rotate %114 by %c17_i32_74 dim 1 : vector<16x512xf32>, i32 -> vector<16x512xf32>
    %116 = vector.broadcast %9 : vector<1x512xf32> to vector<16x512xf32>
    %117 = arith.mulf %115, %116 : vector<16x512xf32>
    %c0_75 = arith.constant 0 : index
    %c0_76 = arith.constant 0 : index
    %c0_77 = arith.constant 0 : index
    %118 = vector.load %arg3[%c0_75, %c0_76, %c0_77] : memref<9x16x16xf32, #tpu.memory_space<vmem>>, vector<1x16x16xf32>
    %119 = vector.shape_cast %118 : vector<1x16x16xf32> to vector<16x16xf32>
    %cst_78 = arith.constant dense<0.000000e+00> : vector<16x512xf32>
    %120 = tpu.matmul %119, %117, %cst_78 {dimension_numbers = #tpu.dot_dimension_numbers<[1], [0], [0], [1], [0, 0, 1, 1], [], []>} : vector<16x16xf32>, vector<16x512xf32>, vector<16x512xf32> -> vector<16x512xf32>
    %c16_i32_79 = arith.constant 16 : i32
    %121 = tpu.dynamic_rotate %114 by %c16_i32_79 dim 1 : vector<16x512xf32>, i32 -> vector<16x512xf32>
    %122 = vector.broadcast %11 : vector<1x512xf32> to vector<16x512xf32>
    %123 = arith.mulf %121, %122 : vector<16x512xf32>
    %c1_80 = arith.constant 1 : index
    %c0_81 = arith.constant 0 : index
    %c0_82 = arith.constant 0 : index
    %124 = vector.load %arg3[%c1_80, %c0_81, %c0_82] : memref<9x16x16xf32, #tpu.memory_space<vmem>>, vector<1x16x16xf32>
    %125 = vector.shape_cast %124 : vector<1x16x16xf32> to vector<16x16xf32>
    %cst_83 = arith.constant dense<0.000000e+00> : vector<16x512xf32>
    %126 = tpu.matmul %125, %123, %cst_83 {dimension_numbers = #tpu.dot_dimension_numbers<[1], [0], [0], [1], [0, 0, 1, 1], [], []>} : vector<16x16xf32>, vector<16x512xf32>, vector<16x512xf32> -> vector<16x512xf32>
    %127 = arith.addf %120, %126 : vector<16x512xf32>
    %c15_i32_84 = arith.constant 15 : i32
    %128 = tpu.dynamic_rotate %114 by %c15_i32_84 dim 1 : vector<16x512xf32>, i32 -> vector<16x512xf32>
    %129 = vector.broadcast %13 : vector<1x512xf32> to vector<16x512xf32>
    %130 = arith.mulf %128, %129 : vector<16x512xf32>
    %c2_85 = arith.constant 2 : index
    %c0_86 = arith.constant 0 : index
    %c0_87 = arith.constant 0 : index
    %131 = vector.load %arg3[%c2_85, %c0_86, %c0_87] : memref<9x16x16xf32, #tpu.memory_space<vmem>>, vector<1x16x16xf32>
    %132 = vector.shape_cast %131 : vector<1x16x16xf32> to vector<16x16xf32>
    %cst_88 = arith.constant dense<0.000000e+00> : vector<16x512xf32>
    %133 = tpu.matmul %132, %130, %cst_88 {dimension_numbers = #tpu.dot_dimension_numbers<[1], [0], [0], [1], [0, 0, 1, 1], [], []>} : vector<16x16xf32>, vector<16x512xf32>, vector<16x512xf32> -> vector<16x512xf32>
    %134 = arith.addf %127, %133 : vector<16x512xf32>
    %c1_i32_89 = arith.constant 1 : i32
    %135 = tpu.dynamic_rotate %114 by %c1_i32_89 dim 1 : vector<16x512xf32>, i32 -> vector<16x512xf32>
    %136 = vector.broadcast %15 : vector<1x512xf32> to vector<16x512xf32>
    %137 = arith.mulf %135, %136 : vector<16x512xf32>
    %c3_90 = arith.constant 3 : index
    %c0_91 = arith.constant 0 : index
    %c0_92 = arith.constant 0 : index
    %138 = vector.load %arg3[%c3_90, %c0_91, %c0_92] : memref<9x16x16xf32, #tpu.memory_space<vmem>>, vector<1x16x16xf32>
    %139 = vector.shape_cast %138 : vector<1x16x16xf32> to vector<16x16xf32>
    %cst_93 = arith.constant dense<0.000000e+00> : vector<16x512xf32>
    %140 = tpu.matmul %139, %137, %cst_93 {dimension_numbers = #tpu.dot_dimension_numbers<[1], [0], [0], [1], [0, 0, 1, 1], [], []>} : vector<16x16xf32>, vector<16x512xf32>, vector<16x512xf32> -> vector<16x512xf32>
    %141 = arith.addf %134, %140 : vector<16x512xf32>
    %c4_94 = arith.constant 4 : index
    %c0_95 = arith.constant 0 : index
    %c0_96 = arith.constant 0 : index
    %142 = vector.load %arg3[%c4_94, %c0_95, %c0_96] : memref<9x16x16xf32, #tpu.memory_space<vmem>>, vector<1x16x16xf32>
    %143 = vector.shape_cast %142 : vector<1x16x16xf32> to vector<16x16xf32>
    %cst_97 = arith.constant dense<0.000000e+00> : vector<16x512xf32>
    %144 = tpu.matmul %143, %114, %cst_97 {dimension_numbers = #tpu.dot_dimension_numbers<[1], [0], [0], [1], [0, 0, 1, 1], [], []>} : vector<16x16xf32>, vector<16x512xf32>, vector<16x512xf32> -> vector<16x512xf32>
    %145 = arith.addf %141, %144 : vector<16x512xf32>
    %c511_i32_98 = arith.constant 511 : i32
    %146 = tpu.dynamic_rotate %114 by %c511_i32_98 dim 1 : vector<16x512xf32>, i32 -> vector<16x512xf32>
    %147 = vector.broadcast %17 : vector<1x512xf32> to vector<16x512xf32>
    %148 = arith.mulf %146, %147 : vector<16x512xf32>
    %c5_99 = arith.constant 5 : index
    %c0_100 = arith.constant 0 : index
    %c0_101 = arith.constant 0 : index
    %149 = vector.load %arg3[%c5_99, %c0_100, %c0_101] : memref<9x16x16xf32, #tpu.memory_space<vmem>>, vector<1x16x16xf32>
    %150 = vector.shape_cast %149 : vector<1x16x16xf32> to vector<16x16xf32>
    %cst_102 = arith.constant dense<0.000000e+00> : vector<16x512xf32>
    %151 = tpu.matmul %150, %148, %cst_102 {dimension_numbers = #tpu.dot_dimension_numbers<[1], [0], [0], [1], [0, 0, 1, 1], [], []>} : vector<16x16xf32>, vector<16x512xf32>, vector<16x512xf32> -> vector<16x512xf32>
    %152 = arith.addf %145, %151 : vector<16x512xf32>
    %c497_i32_103 = arith.constant 497 : i32
    %153 = tpu.dynamic_rotate %114 by %c497_i32_103 dim 1 : vector<16x512xf32>, i32 -> vector<16x512xf32>
    %154 = vector.broadcast %19 : vector<1x512xf32> to vector<16x512xf32>
    %155 = arith.mulf %153, %154 : vector<16x512xf32>
    %c6_104 = arith.constant 6 : index
    %c0_105 = arith.constant 0 : index
    %c0_106 = arith.constant 0 : index
    %156 = vector.load %arg3[%c6_104, %c0_105, %c0_106] : memref<9x16x16xf32, #tpu.memory_space<vmem>>, vector<1x16x16xf32>
    %157 = vector.shape_cast %156 : vector<1x16x16xf32> to vector<16x16xf32>
    %cst_107 = arith.constant dense<0.000000e+00> : vector<16x512xf32>
    %158 = tpu.matmul %157, %155, %cst_107 {dimension_numbers = #tpu.dot_dimension_numbers<[1], [0], [0], [1], [0, 0, 1, 1], [], []>} : vector<16x16xf32>, vector<16x512xf32>, vector<16x512xf32> -> vector<16x512xf32>
    %159 = arith.addf %152, %158 : vector<16x512xf32>
    %c496_i32_108 = arith.constant 496 : i32
    %160 = tpu.dynamic_rotate %114 by %c496_i32_108 dim 1 : vector<16x512xf32>, i32 -> vector<16x512xf32>
    %161 = vector.broadcast %21 : vector<1x512xf32> to vector<16x512xf32>
    %162 = arith.mulf %160, %161 : vector<16x512xf32>
    %c7_109 = arith.constant 7 : index
    %c0_110 = arith.constant 0 : index
    %c0_111 = arith.constant 0 : index
    %163 = vector.load %arg3[%c7_109, %c0_110, %c0_111] : memref<9x16x16xf32, #tpu.memory_space<vmem>>, vector<1x16x16xf32>
    %164 = vector.shape_cast %163 : vector<1x16x16xf32> to vector<16x16xf32>
    %cst_112 = arith.constant dense<0.000000e+00> : vector<16x512xf32>
    %165 = tpu.matmul %164, %162, %cst_112 {dimension_numbers = #tpu.dot_dimension_numbers<[1], [0], [0], [1], [0, 0, 1, 1], [], []>} : vector<16x16xf32>, vector<16x512xf32>, vector<16x512xf32> -> vector<16x512xf32>
    %166 = arith.addf %159, %165 : vector<16x512xf32>
    %c495_i32_113 = arith.constant 495 : i32
    %167 = tpu.dynamic_rotate %114 by %c495_i32_113 dim 1 : vector<16x512xf32>, i32 -> vector<16x512xf32>
    %168 = vector.broadcast %23 : vector<1x512xf32> to vector<16x512xf32>
    %169 = arith.mulf %167, %168 : vector<16x512xf32>
    %c8_114 = arith.constant 8 : index
    %c0_115 = arith.constant 0 : index
    %c0_116 = arith.constant 0 : index
    %170 = vector.load %arg3[%c8_114, %c0_115, %c0_116] : memref<9x16x16xf32, #tpu.memory_space<vmem>>, vector<1x16x16xf32>
    %171 = vector.shape_cast %170 : vector<1x16x16xf32> to vector<16x16xf32>
    %cst_117 = arith.constant dense<0.000000e+00> : vector<16x512xf32>
    %172 = tpu.matmul %171, %169, %cst_117 {dimension_numbers = #tpu.dot_dimension_numbers<[1], [0], [0], [1], [0, 0, 1, 1], [], []>} : vector<16x16xf32>, vector<16x512xf32>, vector<16x512xf32> -> vector<16x512xf32>
    %173 = arith.addf %166, %172 : vector<16x512xf32>
    %174 = vector.broadcast %4 : vector<16x1xf32> to vector<16x512xf32>
    %175 = arith.addf %173, %174 : vector<16x512xf32>
    %cst_118 = arith.constant dense<0.000000e+00> : vector<512xf32>
    %176 = vector.multi_reduction <add>, %175, %cst_118 [0] : vector<16x512xf32> to vector<512xf32>
    %177 = vector.shape_cast %176 : vector<512xf32> to vector<1x512xf32>
    %cst_119 = arith.constant 1.600000e+01 : f32
    %178 = vector.broadcast %cst_119 : f32 to vector<1x512xf32>
    %179 = arith.divf %177, %178 : vector<1x512xf32>
    %180 = vector.broadcast %179 : vector<1x512xf32> to vector<16x512xf32>
    %181 = arith.subf %175, %180 : vector<16x512xf32>
    %182 = arith.mulf %181, %181 : vector<16x512xf32>
    %cst_120 = arith.constant dense<0.000000e+00> : vector<512xf32>
    %183 = vector.multi_reduction <add>, %182, %cst_120 [0] : vector<16x512xf32> to vector<512xf32>
    %184 = vector.shape_cast %183 : vector<512xf32> to vector<1x512xf32>
    %cst_121 = arith.constant 1.600000e+01 : f32
    %185 = vector.broadcast %cst_121 : f32 to vector<1x512xf32>
    %186 = arith.divf %184, %185 : vector<1x512xf32>
    %187 = vector.broadcast %179 : vector<1x512xf32> to vector<16x512xf32>
    %188 = arith.subf %175, %187 : vector<16x512xf32>
    %cst_122 = arith.constant 9.99999974E-6 : f32
    %189 = vector.broadcast %cst_122 : f32 to vector<1x512xf32>
    %190 = arith.addf %186, %189 : vector<1x512xf32>
    %191 = math.rsqrt %190 : vector<1x512xf32>
    %192 = vector.broadcast %191 : vector<1x512xf32> to vector<16x512xf32>
    %193 = arith.mulf %188, %192 : vector<16x512xf32>
    %194 = vector.broadcast %5 : vector<16x1xf32> to vector<16x512xf32>
    %195 = arith.mulf %193, %194 : vector<16x512xf32>
    %196 = vector.broadcast %6 : vector<16x1xf32> to vector<16x512xf32>
    %197 = arith.addf %195, %196 : vector<16x512xf32>
    %c0_123 = arith.constant 0 : index
    %c0_124 = arith.constant 0 : index
    %198 = vector.load %arg4[%c0_123, %c0_124] : memref<16x8xf32, #tpu.memory_space<vmem>>, vector<16x8xf32>
    %cst_125 = arith.constant dense<0.000000e+00> : vector<16x512xf32>
    %199 = tpu.matmul %198, %0, %cst_125 {dimension_numbers = #tpu.dot_dimension_numbers<[1], [0], [0], [1], [0, 0, 1, 1], [], []>} : vector<16x8xf32>, vector<8x512xf32>, vector<16x512xf32> -> vector<16x512xf32>
    %200 = vector.broadcast %7 : vector<16x1xf32> to vector<16x512xf32>
    %201 = arith.addf %199, %200 : vector<16x512xf32>
    %202 = arith.addf %197, %201 : vector<16x512xf32>
    %cst_126 = arith.constant 5.000000e-01 : f32
    %203 = vector.broadcast %cst_126 : f32 to vector<16x512xf32>
    %204 = arith.mulf %203, %202 : vector<16x512xf32>
    %cst_127 = arith.constant 0.707106769 : f32
    %205 = vector.broadcast %cst_127 : f32 to vector<16x512xf32>
    %206 = arith.mulf %202, %205 : vector<16x512xf32>
    %207 = math.erf %206 : vector<16x512xf32>
    %cst_128 = arith.constant 1.000000e+00 : f32
    %208 = vector.broadcast %cst_128 : f32 to vector<16x512xf32>
    %209 = arith.addf %208, %207 : vector<16x512xf32>
    %210 = arith.mulf %204, %209 : vector<16x512xf32>
    %c0_129 = arith.constant 0 : index
    %c0_130 = arith.constant 0 : index
    %211 = vector.load %arg7[%c0_129, %c0_130] : memref<16x512xf32, #tpu.memory_space<vmem>>, vector<16x512xf32>
    tpu.vector_store %arg7[%c0_129, %c0_130], %210 {strides = array<i32>} : memref<16x512xf32, #tpu.memory_space<vmem>>, vector<16x512xf32>,
    return
  }
  func.func @transform_0(%arg0: i32) -> (i32, i32) {
    %c0_i32 = arith.constant 0 : i32
    %c0_i32_0 = arith.constant 0 : i32
    return %c0_i32, %arg0 : i32, i32
  }
  func.func @transform_1(%arg0: i32) -> (i32, i32, i32) {
    %c0_i32 = arith.constant 0 : i32
    %c0_i32_0 = arith.constant 0 : i32
    %c0_i32_1 = arith.constant 0 : i32
    %c0_i32_2 = arith.constant 0 : i32
    return %c0_i32, %c0_i32_0, %c0_i32_1 : i32, i32, i32
  }
  func.func @transform_2(%arg0: i32) -> (i32, i32, i32) {
    %c0_i32 = arith.constant 0 : i32
    %c0_i32_0 = arith.constant 0 : i32
    %c0_i32_1 = arith.constant 0 : i32
    %c0_i32_2 = arith.constant 0 : i32
    return %c0_i32, %c0_i32_0, %c0_i32_1 : i32, i32, i32
  }
  func.func @transform_3(%arg0: i32) -> (i32, i32) {
    %c0_i32 = arith.constant 0 : i32
    %c0_i32_0 = arith.constant 0 : i32
    %c0_i32_1 = arith.constant 0 : i32
    return %c0_i32, %c0_i32_0 : i32, i32
  }
  func.func @transform_4(%arg0: i32) -> (i32, i32) {
    %c0_i32 = arith.constant 0 : i32
    %c0_i32_0 = arith.constant 0 : i32
    %c0_i32_1 = arith.constant 0 : i32
    return %c0_i32, %c0_i32_0 : i32, i32
  }
  func.func @transform_5(%arg0: i32) -> (i32, i32, i32) {
    %c0_i32 = arith.constant 0 : i32
    %c0_i32_0 = arith.constant 0 : i32
    %c0_i32_1 = arith.constant 0 : i32
    %c0_i32_2 = arith.constant 0 : i32
    return %c0_i32, %c0_i32_0, %c0_i32_1 : i32, i32, i32
  }
  func.func @transform_6(%arg0: i32) -> (i32, i32) {
    %c0_i32 = arith.constant 0 : i32
    %c0_i32_0 = arith.constant 0 : i32
    return %c0_i32, %arg0 : i32, i32
  }
}

</mosaic_0001>

<bundles_post_ra>
// kernel: tpu_custom_call.1
= control target key start
LH: loop header
LB: loop body
LE: loop exit
PB: predicated region body
PF: predicated region fallthrough
CT: control target
= control target key end

     0   :  { %s4650_s25 = smov 16   ;;  %v5899_v4 = vmov 0.0   ;;  %s5892_s0 = inlined_call_operand.vmem [shape: f32[8,512], index: 0, kind: input, shape index: {}]   ;;  %s5893_s1 = inlined_call_operand.vmem [shape: f32[9,16,8], index: 1, kind: input, shape index: {}]   ;;  %s5894_s2 = inlined_call_operand.vmem [shape: f32[9,16,16], index: 2, kind: input, shape index: {}]   ;;  %s5895_s3 = inlined_call_operand.vmem [shape: f32[16,8], index: 3, kind: input, shape index: {}]   ;;  %s5896_s4 = inlined_call_operand.vmem [shape: f32[16,7], index: 4, kind: input, shape index: {}]   ;;  %s5897_s5 = inlined_call_operand.vmem [shape: f32[9,1,512], index: 5, kind: input, shape index: {}]   ;;  %s5898_s6 = inlined_call_operand.hbm [shape: f32[16,512], index: 6, kind: output, shape index: {}]  }
   0x1   :  { %v4707_v0 = vld [vmem:[%s5892_s0 + $0x10] sm:$0xff]  ;;  %v4712_v1 = vld [vmem:[%s5892_s0] sm:$0xff]  ;;  %v4721_v2 = vld [vmem:[%s5892_s0 + $0x18] sm:$0xff]  ;;  %199 = vmatprep.mubr.f32.mxu0 %v5899_v4  ;;  %276 = vmatprep.mubr.f32.mxu1 %v5899_v4 }
   0x2   :  { %91 = vrot.lane.b32.xlu1 %v4707_v0, %s4650_s25  ;;  %87 = vrot.lane.b32.xlu0 %v4712_v1, %s4650_s25  ;;  %v4726_v3 = vld [vmem:[%s5892_s0 + $0x8] sm:$0xff] }
   0x6   :  { %93 = vrot.lane.b32.xlu1 %v4721_v2, %s4650_s25  ;;  %89 = vrot.lane.b32.xlu0 %v4726_v3, %s4650_s25 }
   0x7   :  { %11 = vsyncpa [#allocation3], 0  ;;  %s4652_s30 = smov 17   ;;  %s4653_s7 = smov 15   ;;  %v28_v5 = vld [vmem:[%s5896_s4] sm:$0xff]  ;;  %v29_v6 = vld [vmem:[%s5896_s4 + $0x8] sm:$0xff]  ;;  %v53_v10 = vlaneseq }
   0x8   :  { %s4654_s8 = smov 1   ;;  %s4655_s9 = smov 127   ;;  %v4659_v7 = vmov 0   ;;  %v4660_v8 = vmov 1   ;;  %v4661_v9 = vmov 2   ;;  %v4233_v36 = vld [vmem:[%s5893_s1 + $0x10] sm:$0xff] }
   0x9   :  { %s4656_s10 = smov 113   ;;  %s4657_s11 = smov 112   ;;  %4560 = vset.pattern.permute.xlu0 %v4659_v7  ;;  %4561 = vset.pattern.permute.xlu1 %v4659_v7  ;;  %v62_v11 = vshrl.u32 %v53_v10, 7  ;;  %v4796_v12 = vand.u32 127, %v53_v10  ;;  %v4226_v17 = vld [vmem:[%s5897_s5 + $0x4] sm:$0xf] }
   0xa   :  { %47 = vrot.lane.b32.xlu1 %v4726_v3, %s4652_s30  ;;  %45 = vrot.lane.b32.xlu0 %v4712_v1, %s4652_s30  ;;  %s4658_s12 = smov 111   ;;  %v30_v20 = vld [vmem:[%s5897_s5] sm:$0xf]  ;;  %vm128_vm2 = vcmask 64512   ;;  %v4227_v44 = vld [vmem:[%s5897_s5 + $0x8] sm:$0xf] }
   0xb   :  { %v4798_v13 = vsub.s32 3, %v62_v11  ;;  %v4800_v14 = vsub.s32 1, %v62_v11  ;;  %v4802_v15 = vsub.s32 0, %v62_v11  ;;  %v4804_v16 = vsub.s32 2, %v62_v11  ;;  %v4234_v45 = vld [vmem:[%s5893_s1 + $0x18] sm:$0xff]  ;;  %v85_v55 = vld [vmem:[%s5893_s1] sm:$0xff] }
   0xc   :  { %vm95_vm0 = vcmp.lt.s32.totalorder %v4796_v12, 16  ;;  %vm55_vm1 = vcmp.lt.s32.totalorder %v4796_v12, 17  ;;  %vm457_vm3 = vcmp.lt.s32.totalorder %v4796_v12, 15  ;;  %v4228_v63 = vld [vmem:[%s5897_s5 + $0xc] sm:$0xf]  ;;  %vm666_vm4 = vcmp.lt.s32.totalorder %v4796_v12, 1 }
   0xd   :  { %v4814_v21 = vrot.slane %v4226_v17, %v4798_v13  ;;  %v4817_v22 = vrot.slane %v4226_v17, %v4800_v14  ;;  %v4820_v23 = vrot.slane %v4226_v17, %v4802_v15  ;;  %v4823_v24 = vrot.slane %v4226_v17, %v4804_v16 }
   0xe   :  { %51 = vrot.lane.b32.xlu1 %v4721_v2, %s4652_s30  ;;  %49 = vrot.lane.b32.xlu0 %v4707_v0, %s4652_s30  ;;  %v4827_v27 = vrot.slane %v30_v20, %v4800_v14  ;;  %v4847_v40 = vrot.slane %v30_v20, %v4798_v13  ;;  %v4852_v41 = vrot.slane %v30_v20, %v4802_v15  ;;  %vm1046_vm5 = vcmp.lt.s32.totalorder %v4796_v12, 127 }
   0xf   :  { %v4856_v43 = vrot.slane %v30_v20, %v4804_v16  ;;  %v4873_v51 = vrot.slane %v4227_v44, %v4800_v14  ;;  %v4889_v59 = vrot.slane %v4227_v44, %v4802_v15  ;;  %v4895_v61 = vrot.slane %v4227_v44, %v4804_v16  ;;  %v4243_v20 = vld [vmem:[%s5893_s1 + $0x20] sm:$0xff] }
  0x10   :  { %v4898_v62 = vrot.slane %v4227_v44, %v4798_v13  ;;  %v4915_v11 = vrot.slane %v4228_v63, %v4800_v14  ;;  %vm1255_vm6 = vcmp.lt.s32.totalorder %v4796_v12, 113  ;;  %vm1464_vm7 = vcmp.lt.s32.totalorder %v4796_v12, 112 }
  0x11   :  { %vm1673_vm8 = vcmp.lt.s32.totalorder %v4796_v12, 111  ;;  %vm2130_vm9 = vcmask 130048  }
  0x12   :  { %451 = vrot.lane.b32.xlu1 %v4726_v3, %s4653_s7  ;;  %449 = vrot.lane.b32.xlu0 %v4712_v1, %s4653_s7 }
  0x16   :  { %455 = vrot.lane.b32.xlu1 %v4721_v2, %s4653_s7  ;;  %453 = vrot.lane.b32.xlu0 %v4707_v0, %s4653_s7 }
  0x1a   :  { %660 = vrot.lane.b32.xlu1 %v4726_v3, %s4654_s8  ;;  %658 = vrot.lane.b32.xlu0 %v4712_v1, %s4654_s8 }
  0x1e   :  { %664 = vrot.lane.b32.xlu1 %v4721_v2, %s4654_s8  ;;  %662 = vrot.lane.b32.xlu0 %v4707_v0, %s4654_s8 }
  0x22   :  { %1038 = vrot.lane.b32.xlu0 %v4712_v1, %s4655_s9  ;;  %1040 = vrot.lane.b32.xlu1 %v4726_v3, %s4655_s9 }
  0x26   :  { %1042 = vrot.lane.b32.xlu0 %v4707_v0, %s4655_s9  ;;  %1044 = vrot.lane.b32.xlu1 %v4721_v2, %s4655_s9 }
  0x2a   :  { %1247 = vrot.lane.b32.xlu0 %v4712_v1, %s4656_s10  ;;  %1249 = vrot.lane.b32.xlu1 %v4726_v3, %s4656_s10 }
  0x2e   :  { %1251 = vrot.lane.b32.xlu0 %v4707_v0, %s4656_s10  ;;  %1253 = vrot.lane.b32.xlu1 %v4721_v2, %s4656_s10 }
  0x32   :  { %1456 = vrot.lane.b32.xlu0 %v4712_v1, %s4657_s11  ;;  %1458 = vrot.lane.b32.xlu1 %v4726_v3, %s4657_s11 }
  0x36   :  { %1460 = vrot.lane.b32.xlu0 %v4707_v0, %s4657_s11  ;;  %1462 = vrot.lane.b32.xlu1 %v4721_v2, %s4657_s11 }
  0x3a   :  { %1665 = vrot.lane.b32.xlu0 %v4712_v1, %s4658_s12  ;;  %1667 = vrot.lane.b32.xlu1 %v4726_v3, %s4658_s12 }
  0x3e   :  { %1669 = vrot.lane.b32.xlu0 %v4707_v0, %s4658_s12  ;;  %1671 = vrot.lane.b32.xlu1 %v4721_v2, %s4658_s12 }
  0x42   :  { %1876 = vperm.xlu0 %4560, %v28_v5   ;;  %1881 = vperm.xlu1 %4561, %v29_v6  }
  0x46   :  { %4562 = vset.pattern.permute.xlu1 %v4660_v8  ;;  %4563 = vset.pattern.permute.xlu0 %v4660_v8 }
  0x47   :  { %1990 = vperm.xlu1 %4562, %v28_v5   ;;  %1994 = vperm.xlu0 %4563, %v29_v6  }
  0x4b   :  { %4564 = vset.pattern.permute.xlu1 %v4661_v9 }
  0x4c   :  { %2006 = vperm.xlu1 %4564, %v28_v5   ;;  %v86_v5 = vld [vmem:[%s5893_s1 + $0x8] sm:$0xff] }
  0x50   :  { %2010 = vperm.xlu1 %4564, %v29_v6  }
  0x74   :  { %v92_v18 = vpop.permute.xlu1 %91  ;;  %v88_v19 = vpop.permute.xlu0 %87 }
  0x78   :  { %v94_v25 = vpop.permute.xlu1 %93  ;;  %v90_v26 = vpop.permute.xlu0 %89 }
  0x79   :  { %v96_v28 = vsel %vm95_vm0, %v92_v18, %v94_v25  ;;  %v98_v29 = vsel %vm95_vm0, %v88_v19, %v90_v26  ;;  %v99_v30 = vsel %vm95_vm0, %v94_v25, %v88_v19  ;;  %v97_v31 = vsel %vm95_vm0, %v90_v26, %v92_v18 }
  0x7a   :  { %v124_v32 = vmul.f32 %v4814_v21, %v96_v28  ;;  %v122_v33 = vmul.f32 %v4817_v22, %v98_v29  ;;  %v121_v34 = vmul.f32 %v4820_v23, %v99_v30  ;;  %v123_v35 = vmul.f32 %v4823_v24, %v97_v31 }
  0x7b   :  { %v4931_v29 = vrot.slane %v4228_v63, %v4802_v15  ;;  %v4937_v31 = vrot.slane %v4228_v63, %v4804_v16 }
  0x7c   :  { %212 = vmatprep.subr.mxu1 %v124_v32  ;;  %v48_v37 = vpop.permute.xlu1 %47  ;;  %135 = vmatprep.subr.mxu0 %v122_v33  ;;  %v46_v38 = vpop.permute.xlu0 %45  ;;  %v4940_v32 = vrot.slane %v4228_v63, %v4798_v13  ;;  %v4244_v33 = vld [vmem:[%s5893_s1 + $0x28] sm:$0xff] }
  0x7d   :  { %v58_v39 = vsel %vm55_vm1, %v46_v38, %v48_v37  ;;  %136 = vmatpush1.msra.mxu0 %v121_v34  ;;  %213 = vmatpush1.msra.mxu1 %v123_v35 }
  0x7e   :  { %4235 = vmatmul.mubr.msk.f32.vlgmr.msra.gmra.mrb[0].mxu0 %vm128_vm2, %v4233_v36  ;;  %4237 = vmatmul.mubr.msk.f32.vlgmr.msra.gmra.mrb[0].mxu1 %vm128_vm2, %v4233_v36  ;;  %v82_v42 = vmul.f32 %v4827_v27, %v58_v39 }
  0x7f   :  { %205 = vmatprep.mubr.f32.mxu0 %v5899_v4  ;;  %282 = vmatprep.mubr.f32.mxu1 %v5899_v4 }
  0x80   :  { %v52_v46 = vpop.permute.xlu1 %51  ;;  %295 = vmatprep.subr.mxu0 %v82_v42  ;;  %v50_v47 = vpop.permute.xlu0 %49 }
  0x81   :  { %v59_v48 = vsel %vm55_vm1, %v52_v46, %v46_v38  ;;  %v56_v49 = vsel %vm55_vm1, %v50_v47, %v52_v46  ;;  %v57_v50 = vsel %vm55_vm1, %v48_v37, %v50_v47  ;;  %v4229_v46 = vld [vmem:[%s5897_s5 + $0x14] sm:$0xf] }
  0x82   :  { %v81_v52 = vmul.f32 %v4852_v41, %v59_v48  ;;  %v83_v53 = vmul.f32 %v4856_v43, %v57_v50  ;;  %4236 = vmatmul.mubr.msk.f32.gmra.mrb[2].mxu0 %vm128_vm2, %v4234_v45  ;;  %4238 = vmatmul.mubr.msk.f32.gmra.mrb[2].mxu1 %vm128_vm2, %v4234_v45  ;;  %v84_v54 = vmul.f32 %v4847_v40, %v56_v49  ;;  %v4249_v45 = vld [vmem:[%s5893_s1 + $0x30] sm:$0xff] }
  0x83   :  { %359 = vmatprep.mubr.f32.mxu0 %v5899_v4  ;;  %436 = vmatprep.mubr.f32.mxu1 %v5899_v4  ;;  %v4971_v49 = vrot.slane %v4229_v46, %v4800_v14  ;;  %v4974_v50 = vrot.slane %v4229_v46, %v4798_v13 }
  0x84   :  { %v452_v56 = vpop.permute.xlu1 %451  ;;  %296 = vmatpush1.msra.mxu0 %v81_v52  ;;  %372 = vmatprep.subr.mxu1 %v84_v54  ;;  %v450_v57 = vpop.permute.xlu0 %449  ;;  %v4977_v52 = vrot.slane %v4229_v46, %v4802_v15 }
  0x85   :  { %v460_v58 = vsel %vm457_vm3, %v450_v57, %v452_v56  ;;  %373 = vmatpush1.msra.mxu1 %v83_v53 }
  0x86   :  { %v484_v60 = vmul.f32 %v4873_v51, %v460_v58  ;;  %4239 = vmatmul.mubr.msk.f32.vlgmr.msra.gmra.mrb[0].mxu0 %vm128_vm2, %v85_v55  ;;  %4241 = vmatmul.mubr.msk.f32.vlgmr.msra.gmra.mrb[0].mxu1 %vm128_vm2, %v85_v55  ;;  %v4987_v55 = vrot.slane %v4229_v46, %v4804_v16 }
  0x87   :  { %365 = vmatprep.mubr.f32.mxu0 %v5899_v4  ;;  %442 = vmatprep.mubr.f32.mxu1 %v5899_v4 }
  0x88   :  { %v456_v6 = vpop.permute.xlu1 %455  ;;  %496 = vmatprep.subr.mxu0 %v484_v60  ;;  %v454_v7 = vpop.permute.xlu0 %453 }
  0x89   :  { %v461_v8 = vsel %vm457_vm3, %v456_v6, %v450_v57  ;;  %v458_v9 = vsel %vm457_vm3, %v454_v7, %v456_v6  ;;  %v459_v10 = vsel %vm457_vm3, %v452_v56, %v454_v7 }
  0x8a   :  { %v483_v17 = vmul.f32 %v4889_v59, %v461_v8  ;;  %v485_v18 = vmul.f32 %v4895_v61, %v459_v10  ;;  %v486_v19 = vmul.f32 %v4898_v62, %v458_v9  ;;  %4240 = vmatmul.mubr.msk.f32.gmra.mrb[2].mxu0 %vm128_vm2, %v86_v5  ;;  %4242 = vmatmul.mubr.msk.f32.gmra.mrb[2].mxu1 %vm128_vm2, %v86_v5  ;;  %v4255_v5 = vld [vmem:[%s5893_s1 + $0x40] sm:$0xff] }
  0x8b   :  { %560 = vmatprep.mubr.f32.mxu0 %v5899_v4  ;;  %637 = vmatprep.mubr.f32.mxu1 %v5899_v4 }
  0x8c   :  { %v661_v25 = vpop.permute.xlu1 %660  ;;  %497 = vmatpush1.msra.mxu0 %v483_v17  ;;  %573 = vmatprep.subr.mxu1 %v486_v19  ;;  %v659_v26 = vpop.permute.xlu0 %658 }
  0x8d   :  { %v669_v28 = vsel %vm666_vm4, %v659_v26, %v661_v25  ;;  %574 = vmatpush1.msra.mxu1 %v485_v18  ;;  %v4256_v18 = vld [vmem:[%s5893_s1 + $0x48] sm:$0xff] }
  0x8e   :  { %v693_v30 = vmul.f32 %v4915_v11, %v669_v28  ;;  %4245 = vmatmul.mubr.msk.f32.vlgmr.msra.gmra.mrb[0].mxu0 %vm128_vm2, %v4243_v20  ;;  %4247 = vmatmul.mubr.msk.f32.vlgmr.msra.gmra.mrb[0].mxu1 %vm128_vm2, %v4243_v20 }
  0x8f   :  { %566 = vmatprep.mubr.f32.mxu0 %v5899_v4  ;;  %643 = vmatprep.mubr.f32.mxu1 %v5899_v4 }
  0x90   :  { %v665_v34 = vpop.permute.xlu1 %664  ;;  %705 = vmatprep.subr.mxu0 %v693_v30  ;;  %v663_v35 = vpop.permute.xlu0 %662 }
  0x91   :  { %v670_v36 = vsel %vm666_vm4, %v665_v34, %v659_v26  ;;  %v667_v37 = vsel %vm666_vm4, %v663_v35, %v665_v34  ;;  %v668_v38 = vsel %vm666_vm4, %v661_v25, %v663_v35 }
  0x92   :  { %v692_v39 = vmul.f32 %v4931_v29, %v670_v36  ;;  %v694_v42 = vmul.f32 %v4937_v31, %v668_v38  ;;  %v695_v44 = vmul.f32 %v4940_v32, %v667_v37  ;;  %4246 = vmatmul.mubr.msk.f32.gmra.mrb[2].mxu0 %vm128_vm2, %v4244_v33  ;;  %4248 = vmatmul.mubr.msk.f32.gmra.mrb[2].mxu1 %vm128_vm2, %v4244_v33  ;;  %v4261_v37 = vld [vmem:[%s5893_s1 + $0x50] sm:$0xff]  ;;  %v4231_v38 = vld [vmem:[%s5897_s5 + $0x1c] sm:$0xf] }
  0x93   :  { %769 = vmatprep.mubr.f32.mxu0 %v5899_v4  ;;  %846 = vmatprep.mubr.f32.mxu1 %v5899_v4  ;;  %v5061_v46 = vrot.slane %v4231_v38, %v4798_v13 }
  0x94   :  { %706 = vmatpush1.msra.mxu0 %v692_v39  ;;  %782 = vmatprep.subr.mxu1 %v695_v44  ;;  %v1039_v47 = vpop.permute.xlu0 %1038  ;;  %v1041_v48 = vpop.permute.xlu1 %1040 }
  0x95   :  { %783 = vmatpush1.msra.mxu1 %v694_v42  ;;  %876 = vmatprep.subr.mxu0 %v4726_v3  ;;  %v4250_v3 = vld [vmem:[%s5893_s1 + $0x38] sm:$0xff]  ;;  %v1049_v53 = vsel %vm1046_vm5, %v1039_v47, %v1041_v48  ;;  %5938 = vst [vmem:[#allocation10_spill] sm:$0xff] %v5061_v46 }
  0x96   :  { %4251 = vmatmul.mubr.msk.f32.vlgmr.msra.gmra.mrb[0].mxu0 %vm128_vm2, %v4249_v45  ;;  %4253 = vmatmul.mubr.msk.f32.vlgmr.msra.gmra.mrb[0].mxu1 %vm128_vm2, %v4249_v45  ;;  %v5058_v45 = vrot.slane %v4231_v38, %v4800_v14 }
  0x97   :  { %775 = vmatprep.mubr.f32.mxu0 %v5899_v4  ;;  %852 = vmatprep.mubr.f32.mxu1 %v5899_v4 }
  0x98   :  { %v1043_v54 = vpop.permute.xlu0 %1042  ;;  %v1045_v56 = vpop.permute.xlu1 %1044  ;;  %877 = vmatpush1.msra.mxu0 %v4712_v1  ;;  %953 = vmatprep.subr.mxu1 %v4721_v2  ;;  %v1072_v2 = vmul.f32 %v4977_v52, %v1049_v53  ;;  %5937 = vst [vmem:[#allocation9_spill] sm:$0xff] %v5058_v45 }
  0x99   :  { %v1048_v57 = vsel %vm1046_vm5, %v1041_v48, %v1043_v54  ;;  %v1047_v58 = vsel %vm1046_vm5, %v1043_v54, %v1045_v56  ;;  %v1050_v60 = vsel %vm1046_vm5, %v1045_v56, %v1039_v47  ;;  %954 = vmatpush1.msra.mxu1 %v4707_v0  ;;  %v4230_v0 = vld [vmem:[%s5897_s5 + $0x18] sm:$0xf]  ;;  %v5064_v47 = vrot.slane %v4231_v38, %v4802_v15 }
  0x9a   :  { %4252 = vmatmul.mubr.msk.f32.gmra.mrb[2].mxu0 %vm128_vm2, %v4250_v3  ;;  %4254 = vmatmul.mubr.msk.f32.gmra.mrb[2].mxu1 %vm128_vm2, %v4250_v3  ;;  %v1073_v63 = vmul.f32 %v4971_v49, %v1048_v57  ;;  %v1075_v1 = vmul.f32 %v4974_v50, %v1050_v60  ;;  %v1074_v6 = vmul.f32 %v4987_v55, %v1047_v58  ;;  %v4262_v48 = vld [vmem:[%s5893_s1 + $0x58] sm:$0xff] }
  0x9b   :  { %940 = vmatprep.mubr.f32.mxu0 %v5899_v4  ;;  %1017 = vmatprep.mubr.f32.mxu1 %v5899_v4  ;;  %v5016_v9 = vrot.slane %v4230_v0, %v4800_v14  ;;  %v5019_v10 = vrot.slane %v4230_v0, %v4798_v13  ;;  %v5022_v17 = vrot.slane %v4230_v0, %v4802_v15 }
  0x9c   :  { %1085 = vmatprep.subr.mxu0 %v1073_v63  ;;  %v1248_v7 = vpop.permute.xlu0 %1247  ;;  %v1250_v8 = vpop.permute.xlu1 %1249  ;;  %1162 = vmatprep.subr.mxu1 %v1075_v1  ;;  %v5032_v25 = vrot.slane %v4230_v0, %v4804_v16  ;;  %5939 = vst [vmem:[#allocation11_spill] sm:$0xff] %v5064_v47  ;;  %v5074_v54 = vrot.slane %v4231_v38, %v4804_v16  ;;  %v4232_v0 = vld [vmem:[%s5897_s5 + $0x20] sm:$0xf] }
  0x9d   :  { %5933 = vst [vmem:[#allocation5_spill] sm:$0xff] %v5016_v9  ;;  %5934 = vst [vmem:[#allocation6_spill] sm:$0xff] %v5019_v10  ;;  %v1258_v19 = vsel %vm1255_vm6, %v1248_v7, %v1250_v8 }
  0x9e   :  { %4257 = vmatmul.mubr.msk.f32.vlgmr.msra.gmra.mrb[0].mxu0 %vm128_vm2, %v4255_v5  ;;  %4259 = vmatmul.mubr.msk.f32.vlgmr.msra.gmra.mrb[0].mxu1 %vm128_vm2, %v4255_v5  ;;  %5935 = vst [vmem:[#allocation7_spill] sm:$0xff] %v5022_v17  ;;  %5936 = vst [vmem:[#allocation8_spill] sm:$0xff] %v5032_v25  ;;  %v1281_v36 = vmul.f32 %v5022_v17, %v1258_v19  ;;  %v4267_v5 = vld [vmem:[%s5893_s1 + $0x60] sm:$0xff]  ;;  %v5103_v19 = vrot.slane %v4232_v0, %v4798_v13 }
  0x9f   :  { %1086 = vmatpush1.msra.mxu0 %v1072_v2  ;;  %946 = vmatprep.mubr.f32.mxu0 %v5899_v4  ;;  %5940 = vst [vmem:[#allocation12_spill] sm:$0xff] %v5074_v54 }
  0xa0   :  { %1023 = vmatprep.mubr.f32.mxu1 %v5899_v4  ;;  %v1252_v20 = vpop.permute.xlu0 %1251  ;;  %v1254_v26 = vpop.permute.xlu1 %1253  ;;  %1163 = vmatpush1.msra.mxu1 %v1074_v6  ;;  %5942 = vst [vmem:[#allocation14_spill] sm:$0xff] %v5103_v19 }
  0xa1   :  { %v1257_v28 = vsel %vm1255_vm6, %v1250_v8, %v1252_v20  ;;  %v1256_v30 = vsel %vm1255_vm6, %v1252_v20, %v1254_v26  ;;  %v1259_v33 = vsel %vm1255_vm6, %v1254_v26, %v1248_v7  ;;  %v5106_v20 = vrot.slane %v4232_v0, %v4802_v15  ;;  %v4268_v26 = vld [vmem:[%s5893_s1 + $0x68] sm:$0xff] }
  0xa2   :  { %4258 = vmatmul.mubr.msk.f32.gmra.mrb[2].mxu0 %vm128_vm2, %v4256_v18  ;;  %4260 = vmatmul.mubr.msk.f32.gmra.mrb[2].mxu1 %vm128_vm2, %v4256_v18  ;;  %v1282_v34 = vmul.f32 %v5016_v9, %v1257_v28  ;;  %v1284_v35 = vmul.f32 %v5019_v10, %v1259_v33  ;;  %v1283_v39 = vmul.f32 %v5032_v25, %v1256_v30 }
  0xa3   :  { %1149 = vmatprep.mubr.f32.mxu0 %v5899_v4  ;;  %1226 = vmatprep.mubr.f32.mxu1 %v5899_v4  ;;  %v5100_v18 = vrot.slane %v4232_v0, %v4800_v14  ;;  %5943 = vst [vmem:[#allocation15_spill] sm:$0xff] %v5106_v20  ;;  %v5116_v30 = vrot.slane %v4232_v0, %v4804_v16 }
  0xa4   :  { %1294 = vmatprep.subr.mxu0 %v1282_v34  ;;  %v1457_v42 = vpop.permute.xlu0 %1456  ;;  %v1459_v44 = vpop.permute.xlu1 %1458  ;;  %1371 = vmatprep.subr.mxu1 %v1284_v35 }
  0xa5   :  { %v1467_v3 = vsel %vm1464_vm7, %v1457_v42, %v1459_v44  ;;  %5941 = vst [vmem:[#allocation13_spill] sm:$0xff] %v5100_v18  ;;  %5944 = vst [vmem:[#allocation16_spill] sm:$0xff] %v5116_v30 }
  0xa6   :  { %4263 = vmatmul.mubr.msk.f32.vlgmr.msra.gmra.mrb[0].mxu0 %vm128_vm2, %v4261_v37  ;;  %4265 = vmatmul.mubr.msk.f32.vlgmr.msra.gmra.mrb[0].mxu1 %vm128_vm2, %v4261_v37  ;;  %v1490_v2 = vmul.f32 %v5064_v47, %v1467_v3  ;;  %v4273_v37 = vld [vmem:[%s5893_s1 + $0x70] sm:$0xff] }
  0xa7   :  { %1295 = vmatpush1.msra.mxu0 %v1281_v36  ;;  %1155 = vmatprep.mubr.f32.mxu0 %v5899_v4 }
  0xa8   :  { %1232 = vmatprep.mubr.f32.mxu1 %v5899_v4  ;;  %v1461_v53 = vpop.permute.xlu0 %1460  ;;  %v1463_v56 = vpop.permute.xlu1 %1462  ;;  %1372 = vmatpush1.msra.mxu1 %v1283_v39  ;;  %v4274_v39 = vld [vmem:[%s5893_s1 + $0x78] sm:$0xff] }
  0xa9   :  { %v1466_v57 = vsel %vm1464_vm7, %v1459_v44, %v1461_v53  ;;  %v1465_v58 = vsel %vm1464_vm7, %v1461_v53, %v1463_v56  ;;  %v1468_v60 = vsel %vm1464_vm7, %v1463_v56, %v1457_v42  ;;  %v4279_v42 = vld [vmem:[%s5893_s1 + $0x80] sm:$0xff]  ;;  %v4280_v44 = vld [vmem:[%s5893_s1 + $0x88] sm:$0xff] }
  0xaa   :  { %4264 = vmatmul.mubr.msk.f32.gmra.mrb[2].mxu0 %vm128_vm2, %v4262_v48  ;;  %4266 = vmatmul.mubr.msk.f32.gmra.mrb[2].mxu1 %vm128_vm2, %v4262_v48  ;;  %v1491_v63 = vmul.f32 %v5058_v45, %v1466_v57  ;;  %v1493_v1 = vmul.f32 %v5061_v46, %v1468_v60  ;;  %v1492_v6 = vmul.f32 %v5074_v54, %v1465_v58 }
  0xab   :  { %1358 = vmatprep.mubr.f32.mxu0 %v5899_v4  ;;  %1435 = vmatprep.mubr.f32.mxu1 %v5899_v4 }
  0xac   :  { %1503 = vmatprep.subr.mxu0 %v1491_v63  ;;  %v1666_v7 = vpop.permute.xlu0 %1665  ;;  %v1668_v8 = vpop.permute.xlu1 %1667  ;;  %1580 = vmatprep.subr.mxu1 %v1493_v1 }
  0xad   :  { %v1676_v28 = vsel %vm1673_vm8, %v1666_v7, %v1668_v8 }
  0xae   :  { %4269 = vmatmul.mubr.msk.f32.vlgmr.msra.gmra.mrb[0].mxu0 %vm128_vm2, %v4267_v5  ;;  %4271 = vmatmul.mubr.msk.f32.vlgmr.msra.gmra.mrb[0].mxu1 %vm128_vm2, %v4267_v5  ;;  %v1699_v36 = vmul.f32 %v5106_v20, %v1676_v28 }
  0xaf   :  { %1504 = vmatpush1.msra.mxu0 %v1490_v2  ;;  %1364 = vmatprep.mubr.f32.mxu0 %v5899_v4 }
  0xb0   :  { %1441 = vmatprep.mubr.f32.mxu1 %v5899_v4  ;;  %v1670_v14 = vpop.permute.xlu0 %1669  ;;  %v1672_v13 = vpop.permute.xlu1 %1671  ;;  %1581 = vmatpush1.msra.mxu1 %v1492_v6 }
  0xb1   :  { %v1675_v15 = vsel %vm1673_vm8, %v1668_v8, %v1670_v14  ;;  %v1674_v33 = vsel %vm1673_vm8, %v1670_v14, %v1672_v13  ;;  %v1677_v34 = vsel %vm1673_vm8, %v1672_v13, %v1666_v7 }
  0xb2   :  { %4270 = vmatmul.mubr.msk.f32.gmra.mrb[2].mxu0 %vm128_vm2, %v4268_v26  ;;  %4272 = vmatmul.mubr.msk.f32.gmra.mrb[2].mxu1 %vm128_vm2, %v4268_v26  ;;  %v1700_v35 = vmul.f32 %v5100_v18, %v1675_v15  ;;  %v1702_v16 = vmul.f32 %v5103_v19, %v1677_v34  ;;  %v1701_v38 = vmul.f32 %v5116_v30, %v1674_v33 }
  0xb3   :  { %1567 = vmatprep.mubr.f32.mxu0 %v5899_v4  ;;  %1644 = vmatprep.mubr.f32.mxu1 %v5899_v4 }
  0xb4   :  { %1712 = vmatprep.subr.mxu0 %v1700_v35  ;;  %1789 = vmatprep.subr.mxu1 %v1702_v16 }
  0xb6   :  { %4275 = vmatmul.mubr.msk.f32.vlgmr.msra.gmra.mrb[0].mxu0 %vm128_vm2, %v4273_v37  ;;  %4277 = vmatmul.mubr.msk.f32.vlgmr.msra.gmra.mrb[0].mxu1 %vm128_vm2, %v4273_v37 }
  0xb7   :  { %1713 = vmatpush1.msra.mxu0 %v1699_v36  ;;  %1573 = vmatprep.mubr.f32.mxu0 %v5899_v4 }
  0xb8   :  { %1650 = vmatprep.mubr.f32.mxu1 %v5899_v4  ;;  %1790 = vmatpush1.msra.mxu1 %v1701_v38 }
  0xba   :  { %4276 = vmatmul.mubr.msk.f32.gmra.mrb[2].mxu0 %vm128_vm2, %v4274_v39  ;;  %4278 = vmatmul.mubr.msk.f32.gmra.mrb[2].mxu1 %vm128_vm2, %v4274_v39 }
  0xbb   :  { %1776 = vmatprep.mubr.f32.mxu0 %v5899_v4  ;;  %1853 = vmatprep.mubr.f32.mxu1 %v5899_v4 }
  0xbe   :  { %4281 = vmatmul.mubr.msk.f32.vlgmr.msra.gmra.mrb[0].mxu0 %vm128_vm2, %v4279_v42  ;;  %4283 = vmatmul.mubr.msk.f32.vlgmr.msra.gmra.mrb[0].mxu1 %vm128_vm2, %v4279_v42 }
  0xbf   :  { %1782 = vmatprep.mubr.f32.mxu0 %v5899_v4  ;;  %1859 = vmatprep.mubr.f32.mxu1 %v5899_v4 }
  0xc1   :  { %v1877_v57 = vpop.permute.xlu0 %1876  ;;  %v1882_v58 = vpop.permute.xlu1 %1881 }
  0xc2   :  { %4282 = vmatmul.mubr.msk.f32.gmra.mrb[2].mxu0 %vm128_vm2, %v4280_v44  ;;  %4284 = vmatmul.mubr.msk.f32.gmra.mrb[2].mxu1 %vm128_vm2, %v4280_v44 }
  0xc3   :  { %2201 = vmatprep.mubr.f32.mxu0 %v5899_v4  ;;  %2278 = vmatprep.mubr.f32.mxu1 %v5899_v4 }
 0x191   :  { %v1778_v48 = vpop.f32.mrb[0].mxu0  ;;  %v1855_v3 = vpop.f32.mrb[0].mxu1 }
 0x192   :  { %v1780_v53 = vpop.f32.mrb[1].mxu0  ;;  %v1857_v56 = vpop.f32.mrb[1].mxu1  ;;  %v1884_v1 = vadd.f32 %v1877_v57, %v1778_v48  ;;  %v1886_v5 = vadd.f32 %v1877_v57, %v1855_v3 }
 0x193   :  { %v1885_v8 = vadd.f32 %v1877_v57, %v1780_v53  ;;  %v1887_v26 = vadd.f32 %v1877_v57, %v1857_v56 }
 0x195   :  { %v1784_v60 = vpop.f32.mrb[2].mxu0  ;;  %v1861_v63 = vpop.f32.mrb[2].mxu1 }
 0x196   :  { %v1888_v2 = vadd.f32 %v1882_v58, %v1784_v60  ;;  %v1890_v0 = vadd.f32 %v1882_v58, %v1861_v63  ;;  %v1786_v6 = vpop.f32.mrb[3].mxu0  ;;  %v1863_v7 = vpop.f32.mrb[3].mxu1 }
 0x197   :  { %v1889_v28 = vadd.f32 %v1882_v58, %v1786_v6  ;;  %v1891_v14 = vadd.f32 %v1882_v58, %v1863_v7 }
 0x198   :  { %v1892_v13 = vadd.f32 %v1888_v2, %v1884_v1  ;;  %v1906_v15 = vadd.f32 %v1890_v0, %v1886_v5 }
 0x199   :  { %v1899_v33 = vadd.f32 %v1889_v28, %v1885_v8  ;;  %v1913_v34 = vadd.f32 %v1891_v14, %v1887_v26 }
 0x19a   :  { %v1893_v35 = vrot.slane %v1892_v13, 4  ;;  %v1907_v16 = vrot.slane %v1906_v15, 4 }
 0x19b   :  { %v1900_v36 = vrot.slane %v1899_v33, 4  ;;  %v1914_v37 = vrot.slane %v1913_v34, 4 }
 0x19c   :  { %v1894_v38 = vadd.f32 %v1893_v35, %v1892_v13  ;;  %v1908_v39 = vadd.f32 %v1907_v16, %v1906_v15 }
 0x19d   :  { %v1901_v42 = vadd.f32 %v1900_v36, %v1899_v33  ;;  %v1915_v44 = vadd.f32 %v1914_v37, %v1913_v34 }
 0x19e   :  { %v1895_v48 = vrot.slane %v1894_v38, 2  ;;  %v1909_v3 = vrot.slane %v1908_v39, 2 }
 0x19f   :  { %v1902_v60 = vrot.slane %v1901_v42, 2  ;;  %v1916_v63 = vrot.slane %v1915_v44, 2 }
 0x1a0   :  { %v1896_v53 = vadd.f32 %v1895_v48, %v1894_v38  ;;  %v1910_v56 = vadd.f32 %v1909_v3, %v1908_v39 }
 0x1a1   :  { %v1903_v57 = vadd.f32 %v1902_v60, %v1901_v42  ;;  %v1917_v58 = vadd.f32 %v1916_v63, %v1915_v44 }
 0x1a2   :  { %v1897_v6 = vrot.slane %v1896_v53, 1  ;;  %v1911_v7 = vrot.slane %v1910_v56, 1 }
 0x1a3   :  { %v1904_v4 = vrot.slane %v1903_v57, 1  ;;  %v1918_v19 = vrot.slane %v1917_v58, 1 }
 0x1a4   :  { %v1898_v30 = vadd.f32 %v1897_v6, %v1896_v53  ;;  %v1912_v18 = vadd.f32 %v1911_v7, %v1910_v56 }
 0x1a5   :  { %v1905_v20 = vadd.f32 %v1904_v4, %v1903_v57  ;;  %v1919_v46 = vadd.f32 %v1918_v19, %v1917_v58 }
 0x1a6   :  { %v1921_v13 = vmul.f32 0.0625, %v1898_v30  ;;  %v1923_v15 = vmul.f32 0.0625, %v1912_v18 }
 0x1a7   :  { %v1922_v33 = vmul.f32 0.0625, %v1905_v20  ;;  %v1924_v34 = vmul.f32 0.0625, %v1919_v46 }
 0x1a8   :  { %v1925_v35 = vsub.f32 %v1884_v1, %v1921_v13  ;;  %v1929_v16 = vsub.f32 %v1888_v2, %v1921_v13  ;;  %v5160_v36 = vsub.f32 %v1886_v5, %v1923_v15  ;;  %v1931_v37 = vsub.f32 %v1890_v0, %v1923_v15 }
 0x1a9   :  { %v5162_v38 = vsub.f32 %v1885_v8, %v1922_v33  ;;  %v1930_v39 = vsub.f32 %v1889_v28, %v1922_v33  ;;  %v5164_v42 = vsub.f32 %v1887_v26, %v1924_v34  ;;  %v5166_v44 = vsub.f32 %v1891_v14, %v1924_v34 }
 0x1aa   :  { %v1933_v48 = vmul.f32 %v1925_v35, %v1925_v35  ;;  %v1937_v3 = vmul.f32 %v1929_v16, %v1929_v16  ;;  %v1935_v4 = vmul.f32 %v5160_v36, %v5160_v36  ;;  %v1939_v18 = vmul.f32 %v1931_v37, %v1931_v37 }
 0x1ab   :  { %v1934_v46 = vmul.f32 %v5162_v38, %v5162_v38  ;;  %v1938_v19 = vmul.f32 %v1930_v39, %v1930_v39  ;;  %v1936_v20 = vmul.f32 %v5164_v42, %v5164_v42  ;;  %v1940_v30 = vmul.f32 %v5166_v44, %v5166_v44 }
 0x1ac   :  { %v1941_v1 = vadd.f32 %v1937_v3, %v1933_v48  ;;  %v1955_v2 = vadd.f32 %v1939_v18, %v1935_v4 }
 0x1ad   :  { %v1948_v5 = vadd.f32 %v1938_v19, %v1934_v46  ;;  %v1962_v0 = vadd.f32 %v1940_v30, %v1936_v20 }
 0x1ae   :  { %v1942_v8 = vrot.slane %v1941_v1, 4  ;;  %v1956_v26 = vrot.slane %v1955_v2, 4 }
 0x1af   :  { %v1949_v28 = vrot.slane %v1948_v5, 4  ;;  %v1963_v14 = vrot.slane %v1962_v0, 4 }
 0x1b0   :  { %v1943_v60 = vadd.f32 %v1942_v8, %v1941_v1  ;;  %v1957_v63 = vadd.f32 %v1956_v26, %v1955_v2 }
 0x1b1   :  { %v1950_v53 = vadd.f32 %v1949_v28, %v1948_v5  ;;  %v1964_v56 = vadd.f32 %v1963_v14, %v1962_v0 }
 0x1b2   :  { %v1944_v57 = vrot.slane %v1943_v60, 2  ;;  %v1958_v58 = vrot.slane %v1957_v63, 2 }
 0x1b3   :  { %v1951_v6 = vrot.slane %v1950_v53, 2  ;;  %v1965_v7 = vrot.slane %v1964_v56, 2 }
 0x1b4   :  { %v1945_v13 = vadd.f32 %v1944_v57, %v1943_v60  ;;  %v1959_v15 = vadd.f32 %v1958_v58, %v1957_v63  ;;  %v1991_v60 = vpop.permute.xlu1 %1990 }
 0x1b5   :  { %v1952_v33 = vadd.f32 %v1951_v6, %v1950_v53  ;;  %v1966_v34 = vadd.f32 %v1965_v7, %v1964_v56  ;;  %v5178_v56 = vpop.permute.xlu0 %1994 }
 0x1b6   :  { %v1946_v48 = vrot.slane %v1945_v13, 1  ;;  %v1960_v3 = vrot.slane %v1959_v15, 1 }
 0x1b7   :  { %v1953_v4 = vrot.slane %v1952_v33, 1  ;;  %v1967_v18 = vrot.slane %v1966_v34, 1 }
 0x1b8   :  { %v1947_v46 = vadd.f32 %v1946_v48, %v1945_v13  ;;  %v1961_v19 = vadd.f32 %v1960_v3, %v1959_v15  ;;  %v5176_v53 = vpop.permute.xlu1 %2006 }
 0x1b9   :  { %v1954_v20 = vadd.f32 %v1953_v4, %v1952_v33  ;;  %v1968_v30 = vadd.f32 %v1967_v18, %v1966_v34 }
 0x1ba   :  { %v1969_v1 = vmul.f32 0.0625, %v1947_v46  ;;  %v1971_v2 = vmul.f32 0.0625, %v1961_v19 }
 0x1bb   :  { %v1970_v5 = vmul.f32 0.0625, %v1954_v20  ;;  %v1972_v0 = vmul.f32 0.0625, %v1968_v30 }
 0x1bc   :  { %v1973_v8 = vadd.f32 1e-05, %v1969_v1  ;;  %v1975_v26 = vadd.f32 1e-05, %v1971_v2 }
 0x1bd   :  { %v1974_v28 = vadd.f32 1e-05, %v1970_v5  ;;  %v1976_v14 = vadd.f32 1e-05, %v1972_v0 }
 0x1be   :  { %4572 = vrsqrt.f32 %v1973_v8 }
 0x1bf   :  { %4574 = vrsqrt.f32 %v1975_v26 }
 0x1c0   :  { %4576 = vrsqrt.f32 %v1974_v28 }
 0x1c1   :  { %4578 = vrsqrt.f32 %v1976_v14 }
 0x1c8   :  { %v4573_v63 = vpop.eup %4572 }
 0x1c9   :  { %v4575_v57 = vpop.eup %4574  ;;  %v1985_v58 = vmul.f32 %v4573_v63, %v1929_v16  ;;  %v1981_v6 = vmul.f32 %v4573_v63, %v1925_v35 }
 0x1ca   :  { %v4577_v7 = vpop.eup %4576  ;;  %v1987_v13 = vmul.f32 %v4575_v57, %v1931_v37  ;;  %v1983_v15 = vmul.f32 %v4575_v57, %v5160_v36  ;;  %v2011_v37 = vpop.permute.xlu1 %2010 }
 0x1cb   :  { %v4579_v33 = vpop.eup %4578  ;;  %v1986_v34 = vmul.f32 %v4577_v7, %v1930_v39  ;;  %v1982_v48 = vmul.f32 %v4577_v7, %v5162_v38  ;;  %v1997_v3 = vmul.f32 %v1991_v60, %v1981_v6  ;;  %v2001_v4 = vmul.f32 %v5178_v56, %v1985_v58 }
 0x1cc   :  { %v1988_v18 = vmul.f32 %v4579_v33, %v5166_v44  ;;  %v1984_v46 = vmul.f32 %v4579_v33, %v5164_v42  ;;  %v1999_v19 = vmul.f32 %v1991_v60, %v1983_v15  ;;  %v2003_v20 = vmul.f32 %v5178_v56, %v1987_v13 }
 0x1cd   :  { %v2013_v35 = vadd.f32 %v5176_v53, %v1997_v3  ;;  %v2017_v30 = vadd.f32 %v2011_v37, %v2001_v4  ;;  %v1998_v3 = vmul.f32 %v1991_v60, %v1982_v48 }
 0x1ce   :  { %v2015_v16 = vadd.f32 %v5176_v53, %v1999_v19  ;;  %v2019_v1 = vadd.f32 %v2011_v37, %v2003_v20  ;;  %v2000_v4 = vmul.f32 %v1991_v60, %v1984_v46  ;;  %v2002_v20 = vmul.f32 %v5178_v56, %v1986_v34 }
 0x1cf   :  { %v2029_v36 = vmul.f32 0.70710677, %v2013_v35  ;;  %v2033_v38 = vmul.f32 0.70710677, %v2017_v30  ;;  %v2021_v5 = vmul.f32 0.5, %v2013_v35  ;;  %v2025_v63 = vmul.f32 0.5, %v2017_v30 }
 0x1d0   :  { %v2031_v39 = vmul.f32 0.70710677, %v2015_v16  ;;  %v2035_v2 = vmul.f32 0.70710677, %v2019_v1  ;;  %v2023_v14 = vmul.f32 0.5, %v2015_v16  ;;  %v2027_v15 = vmul.f32 0.5, %v2019_v1 }
 0x1d1   :  { %4580 = verf.f32 %v2029_v36  ;;  %v2014_v19 = vadd.f32 %v5176_v53, %v1998_v3  ;;  %v2016_v35 = vadd.f32 %v5176_v53, %v2000_v4  ;;  %v2004_v60 = vmul.f32 %v5178_v56, %v1988_v18 }
 0x1d2   :  { %4582 = verf.f32 %v2031_v39  ;;  %v2018_v46 = vadd.f32 %v2011_v37, %v2002_v20 }
 0x1d3   :  { %4584 = verf.f32 %v2033_v38  ;;  %v2030_v48 = vmul.f32 0.70710677, %v2014_v19  ;;  %v2032_v16 = vmul.f32 0.70710677, %v2016_v35  ;;  %v2020_v34 = vadd.f32 %v2011_v37, %v2004_v60 }
 0x1d4   :  { %4586 = verf.f32 %v2035_v2  ;;  %v2034_v53 = vmul.f32 0.70710677, %v2018_v46  ;;  %v2022_v39 = vmul.f32 0.5, %v2014_v19 }
 0x1d5   :  { %4588 = verf.f32 %v2030_v48  ;;  %v2036_v36 = vmul.f32 0.70710677, %v2020_v34 }
 0x1d6   :  { %4590 = verf.f32 %v2032_v16 }
 0x1d7   :  { %4592 = verf.f32 %v2034_v53  ;;  %v4620_v53 = vld [vmem:[%s5896_s4] sm:$0xff] }
 0x1d8   :  { %4594 = verf.f32 %v2036_v36  ;;  %v4621_v36 = vld [vmem:[%s5896_s4 + $0x8] sm:$0xff] }
 0x1db   :  { %v4581_v44 = vpop.eup %4580 }
 0x1dc   :  { %v4583_v42 = vpop.eup %4582  ;;  %v2045_v0 = vadd.f32 1.0, %v4581_v44 }
 0x1dd   :  { %v2047_v8 = vadd.f32 1.0, %v4583_v42  ;;  %v4585_v28 = vpop.eup %4584  ;;  %v2024_v42 = vmul.f32 0.5, %v2016_v35 }
 0x1de   :  { %v5188_v26 = vmul.f32 %v2045_v0, %v2021_v5  ;;  %v2049_v57 = vadd.f32 1.0, %v4585_v28  ;;  %v4587_v58 = vpop.eup %4586  ;;  %v2026_v5 = vmul.f32 0.5, %v2018_v46 }
 0x1df   :  { %v5192_v6 = vmul.f32 %v2047_v8, %v2023_v14  ;;  %v2051_v7 = vadd.f32 1.0, %v4587_v58  ;;  %v4589_v56 = vpop.eup %4588  ;;  %v2028_v14 = vmul.f32 0.5, %v2020_v34  ;;  %v4662_v34 = vmov 3  }
 0x1e0   :  { %2095 = vrot.lane.b32.xlu0 %v5188_v26, %s4650_s25  ;;  %v5194_v13 = vmul.f32 %v2049_v57, %v2025_v63  ;;  %v4591_v18 = vpop.eup %4590  ;;  %v2046_v37 = vadd.f32 1.0, %v4589_v56  ;;  %4566 = vset.pattern.permute.xlu1 %v4662_v34 }
 0x1e1   :  { %v5200_v33 = vmul.f32 %v2051_v7, %v2027_v15  ;;  %v4593_v30 = vpop.eup %4592  ;;  %v2048_v1 = vadd.f32 1.0, %v4591_v18  ;;  %4565 = vset.pattern.permute.xlu0 %v4662_v34 }
 0x1e2   :  { %2097 = vrot.lane.b32.xlu1 %v5194_v13, %s4650_s25  ;;  %v5254_v38 = vmul.f32 %v2046_v37, %v2022_v39  ;;  %v2050_v2 = vadd.f32 1.0, %v4593_v30  ;;  %v4595_v44 = vpop.eup %4594  ;;  %v4663_v37 = vmov 4  }
 0x1e3   :  { %v5260_v0 = vmul.f32 %v2048_v1, %v2024_v42  ;;  %v2052_v8 = vadd.f32 1.0, %v4595_v44  ;;  %v4664_v1 = vmov 5  }
 0x1e4   :  { %2103 = vrot.lane.b32.xlu0 %v5192_v6, %s4650_s25  ;;  %v5262_v28 = vmul.f32 %v2050_v2, %v2026_v5  ;;  %v4665_v2 = vmov 6  }
 0x1e5   :  { %v5268_v63 = vmul.f32 %v2052_v8, %v2028_v14 }
 0x1e6   :  { %2105 = vrot.lane.b32.xlu1 %v5200_v33, %s4650_s25 }
 0x1e8   :  { %2061 = vrot.lane.b32.xlu0 %v5188_v26, %s4652_s30 }
 0x1ea   :  { %2063 = vrot.lane.b32.xlu1 %v5194_v13, %s4652_s30 }
 0x1ec   :  { %2069 = vrot.lane.b32.xlu0 %v5192_v6, %s4652_s30 }
 0x1ee   :  { %2071 = vrot.lane.b32.xlu1 %v5200_v33, %s4652_s30 }
 0x1f0   :  { %2451 = vrot.lane.b32.xlu0 %v5188_v26, %s4653_s7 }
 0x1f2   :  { %2453 = vrot.lane.b32.xlu1 %v5194_v13, %s4653_s7 }
 0x1f4   :  { %2459 = vrot.lane.b32.xlu0 %v5192_v6, %s4653_s7 }
 0x1f6   :  { %2461 = vrot.lane.b32.xlu1 %v5200_v33, %s4653_s7 }
 0x1f8   :  { %2654 = vrot.lane.b32.xlu0 %v5188_v26, %s4654_s8 }
 0x1fa   :  { %2656 = vrot.lane.b32.xlu1 %v5194_v13, %s4654_s8 }
 0x1fc   :  { %2662 = vrot.lane.b32.xlu0 %v5192_v6, %s4654_s8 }
 0x1fe   :  { %2664 = vrot.lane.b32.xlu1 %v5200_v33, %s4654_s8 }
 0x200   :  { %3028 = vrot.lane.b32.xlu0 %v5188_v26, %s4655_s9 }
 0x202   :  { %3030 = vrot.lane.b32.xlu1 %v5194_v13, %s4655_s9 }
 0x204   :  { %3036 = vrot.lane.b32.xlu0 %v5192_v6, %s4655_s9 }
 0x206   :  { %3038 = vrot.lane.b32.xlu1 %v5200_v33, %s4655_s9 }
 0x208   :  { %3231 = vrot.lane.b32.xlu0 %v5188_v26, %s4656_s10 }
 0x20a   :  { %3233 = vrot.lane.b32.xlu1 %v5194_v13, %s4656_s10 }
 0x20c   :  { %3239 = vrot.lane.b32.xlu0 %v5192_v6, %s4656_s10 }
 0x20e   :  { %3241 = vrot.lane.b32.xlu1 %v5200_v33, %s4656_s10 }
 0x210   :  { %3434 = vrot.lane.b32.xlu0 %v5188_v26, %s4657_s11 }
 0x212   :  { %3436 = vrot.lane.b32.xlu1 %v5194_v13, %s4657_s11 }
 0x214   :  { %3442 = vrot.lane.b32.xlu0 %v5192_v6, %s4657_s11 }
 0x216   :  { %3444 = vrot.lane.b32.xlu1 %v5200_v33, %s4657_s11 }
 0x218   :  { %2099 = vrot.lane.b32.xlu0 %v5254_v38, %s4650_s25 }
 0x21a   :  { %2101 = vrot.lane.b32.xlu1 %v5262_v28, %s4650_s25 }
 0x21c   :  { %2107 = vrot.lane.b32.xlu0 %v5260_v0, %s4650_s25 }
 0x21e   :  { %2109 = vrot.lane.b32.xlu1 %v5268_v63, %s4650_s25 }
 0x220   :  { %2065 = vrot.lane.b32.xlu0 %v5254_v38, %s4652_s30 }
 0x222   :  { %2067 = vrot.lane.b32.xlu1 %v5262_v28, %s4652_s30 }
 0x224   :  { %2073 = vrot.lane.b32.xlu0 %v5260_v0, %s4652_s30 }
 0x226   :  { %2075 = vrot.lane.b32.xlu1 %v5268_v63, %s4652_s30 }
 0x228   :  { %2455 = vrot.lane.b32.xlu0 %v5254_v38, %s4653_s7 }
 0x22a   :  { %2457 = vrot.lane.b32.xlu1 %v5262_v28, %s4653_s7 }
 0x22c   :  { %2463 = vrot.lane.b32.xlu0 %v5260_v0, %s4653_s7 }
 0x22e   :  { %2465 = vrot.lane.b32.xlu1 %v5268_v63, %s4653_s7 }
 0x230   :  { %2658 = vrot.lane.b32.xlu0 %v5254_v38, %s4654_s8 }
 0x232   :  { %2660 = vrot.lane.b32.xlu1 %v5262_v28, %s4654_s8 }
 0x234   :  { %2666 = vrot.lane.b32.xlu0 %v5260_v0, %s4654_s8 }
 0x236   :  { %2668 = vrot.lane.b32.xlu1 %v5268_v63, %s4654_s8 }
 0x238   :  { %3637 = vrot.lane.b32.xlu0 %v5188_v26, %s4658_s12 }
 0x23a   :  { %3639 = vrot.lane.b32.xlu1 %v5194_v13, %s4658_s12 }
 0x23c   :  { %3645 = vrot.lane.b32.xlu0 %v5192_v6, %s4658_s12 }
 0x23e   :  { %3647 = vrot.lane.b32.xlu1 %v5200_v33, %s4658_s12 }
 0x240   :  { %3032 = vrot.lane.b32.xlu0 %v5254_v38, %s4655_s9 }
 0x242   :  { %3034 = vrot.lane.b32.xlu1 %v5262_v28, %s4655_s9 }
 0x244   :  { %3040 = vrot.lane.b32.xlu0 %v5260_v0, %s4655_s9 }
 0x246   :  { %3042 = vrot.lane.b32.xlu1 %v5268_v63, %s4655_s9 }
 0x248   :  { %3235 = vrot.lane.b32.xlu0 %v5254_v38, %s4656_s10 }
 0x24a   :  { %3237 = vrot.lane.b32.xlu1 %v5262_v28, %s4656_s10 }
 0x24c   :  { %3243 = vrot.lane.b32.xlu0 %v5260_v0, %s4656_s10 }
 0x24e   :  { %3245 = vrot.lane.b32.xlu1 %v5268_v63, %s4656_s10 }
 0x250   :  { %3438 = vrot.lane.b32.xlu0 %v5254_v38, %s4657_s11 }
 0x252   :  { %v5322_v57 = vpop.permute.xlu0 %2095  ;;  %3440 = vrot.lane.b32.xlu1 %v5262_v28, %s4657_s11 }
 0x254   :  { %3446 = vrot.lane.b32.xlu0 %v5260_v0, %s4657_s11  ;;  %v5328_v58 = vpop.permute.xlu1 %2097 }
 0x256   :  { %v2104_v7 = vpop.permute.xlu0 %2103  ;;  %3448 = vrot.lane.b32.xlu1 %v5268_v63, %s4657_s11 }
 0x258   :  { %3641 = vrot.lane.b32.xlu0 %v5254_v38, %s4658_s12  ;;  %v5334_v15 = vpop.permute.xlu1 %2105 }
 0x25a   :  { %v5336_v3 = vpop.permute.xlu0 %2061  ;;  %3643 = vrot.lane.b32.xlu1 %v5262_v28, %s4658_s12 }
 0x25c   :  { %3649 = vrot.lane.b32.xlu0 %v5260_v0, %s4658_s12  ;;  %v5342_v4 = vpop.permute.xlu1 %2063 }
 0x25e   :  { %v5344_v19 = vpop.permute.xlu0 %2069  ;;  %3651 = vrot.lane.b32.xlu1 %v5268_v63, %s4658_s12 }
 0x260   :  { %v5348_v20 = vpop.permute.xlu1 %2071  ;;  %3841 = vperm.xlu0 %4565, %v4620_v53  }
 0x262   :  { %v5350_v35 = vpop.permute.xlu0 %2451  ;;  %3845 = vperm.xlu1 %4566, %v4621_v36  }
 0x264   :  { %v5352_v48 = vpop.permute.xlu1 %2453  ;;  %4568 = vset.pattern.permute.xlu0 %v4663_v37 }
 0x265   :  { %3957 = vperm.xlu0 %4568, %v4621_v36  }
 0x266   :  { %v5354_v60 = vpop.permute.xlu0 %2459  ;;  %4567 = vset.pattern.permute.xlu1 %v4663_v37 }
 0x267   :  { %3953 = vperm.xlu1 %4567, %v4620_v53  }
 0x268   :  { %v5356_v46 = vpop.permute.xlu1 %2461 }
 0x269   :  { %4570 = vset.pattern.permute.xlu0 %v4665_v2 }
 0x26a   :  { %v5358_v16 = vpop.permute.xlu0 %2654  ;;  %3987 = vperm.xlu0 %4570, %v4620_v53  }
 0x26b   :  { %4569 = vset.pattern.permute.xlu1 %v4664_v1 }
 0x26c   :  { %v5366_v56 = vpop.permute.xlu1 %2656  ;;  %3969 = vperm.xlu1 %4569, %v4620_v53  }
 0x26e   :  { %v5368_v18 = vpop.permute.xlu0 %2662 }
 0x270   :  { %v5370_v30 = vpop.permute.xlu1 %2664  ;;  %3973 = vperm.xlu1 %4569, %v4621_v36  }
 0x272   :  { %v5372_v39 = vpop.permute.xlu0 %3028 }
 0x274   :  { %v5374_v44 = vpop.permute.xlu1 %3030  ;;  %4571 = vset.pattern.permute.xlu1 %v4665_v2 }
 0x275   :  { %3991 = vperm.xlu1 %4571, %v4621_v36  }
 0x276   :  { %v5376_v42 = vpop.permute.xlu0 %3036 }
 0x278   :  { %v5378_v5 = vpop.permute.xlu1 %3038 }
 0x27a   :  { %v5380_v8 = vpop.permute.xlu0 %3231 }
 0x27b   :  { %5945 = vst [vmem:[#allocation17_spill] sm:$0xff] %v5380_v8 }
 0x27c   :  { %v5382_v14 = vpop.permute.xlu1 %3233 }
 0x27d   :  { %5946 = vst [vmem:[#allocation18_spill] sm:$0xff] %v5382_v14 }
 0x27e   :  { %v5384_v34 = vpop.permute.xlu0 %3239 }
 0x27f   :  { %5947 = vst [vmem:[#allocation19_spill] sm:$0xff] %v5384_v34 }
 0x280   :  { %v5386_v37 = vpop.permute.xlu1 %3241 }
 0x281   :  { %5948 = vst [vmem:[#allocation20_spill] sm:$0xff] %v5386_v37 }
 0x282   :  { %v5388_v1 = vpop.permute.xlu0 %3434 }
 0x283   :  { %5949 = vst [vmem:[#allocation21_spill] sm:$0xff] %v5388_v1 }
 0x284   :  { %v5390_v53 = vpop.permute.xlu1 %3436 }
 0x285   :  { %5950 = vst [vmem:[#allocation22_spill] sm:$0xff] %v5390_v53 }
 0x286   :  { %v5392_v54 = vpop.permute.xlu0 %3442 }
 0x287   :  { %5951 = vst [vmem:[#allocation23_spill] sm:$0xff] %v5392_v54 }
 0x288   :  { %v5394_v45 = vpop.permute.xlu1 %3444 }
 0x289   :  { %5952 = vst [vmem:[#allocation24_spill] sm:$0xff] %v5394_v45 }
 0x28a   :  { %v2100_v47 = vpop.permute.xlu0 %2099 }
 0x28b   :  { %v2115_v2 = vsel %vm95_vm0, %v5322_v57, %v2100_v47  ;;  %v2113_v53 = vsel %vm95_vm0, %v2100_v47, %v2104_v7 }
 0x28c   :  { %v2102_v10 = vpop.permute.xlu1 %2101  ;;  %v2120_v25 = vmul.f32 %v2115_v2, %v4817_v22  ;;  %v2121_v37 = vmul.f32 %v2113_v53, %v4823_v24 }
 0x28d   :  { %v2116_v36 = vsel %vm95_vm0, %v5328_v58, %v2102_v10  ;;  %v2114_v54 = vsel %vm95_vm0, %v2102_v10, %v5334_v15 }
 0x28e   :  { %v2108_v14 = vpop.permute.xlu0 %2107  ;;  %v2124_v2 = vmul.f32 %v2116_v36, %v4817_v22 }
 0x28f   :  { %v2111_v1 = vsel %vm95_vm0, %v2104_v7, %v2108_v14  ;;  %v2117_v45 = vsel %vm95_vm0, %v2108_v14, %v5322_v57  ;;  %v2125_v7 = vmul.f32 %v2114_v54, %v4823_v24 }
 0x290   :  { %v2110_v9 = vpop.permute.xlu1 %2109  ;;  %v2119_v17 = vmul.f32 %v2117_v45, %v4820_v23  ;;  %v2122_v47 = vmul.f32 %v2111_v1, %v4814_v21  ;;  %v4341_v8 = vpack.c.bf16 %v2124_v2, %v2120_v25 }
 0x291   :  { %v2112_v57 = vsel %vm95_vm0, %v5334_v15, %v2110_v9  ;;  %v2118_v10 = vsel %vm95_vm0, %v2110_v9, %v5328_v58  ;;  %v4347_v15 = vpack.c.bf16 %v2125_v7, %v2121_v37 }
 0x292   :  { %v2066_v34 = vpop.permute.xlu0 %2065  ;;  %v2123_v45 = vmul.f32 %v2118_v10, %v4820_v23  ;;  %v2126_v14 = vmul.f32 %v2112_v57, %v4814_v21  ;;  %4342 = vmatprep.subr.bf16.mxu0 %v4341_v8  ;;  %v4285_v8 = vld [vmem:[%s5894_s2 + $0x10] sm:$0xff] }
 0x293   :  { %v2081_v22 = vsel %vm55_vm1, %v5336_v3, %v2066_v34 }
 0x294   :  { %v4343_v25 = vpack.c.bf16 %v2123_v45, %v2119_v17  ;;  %v2068_v1 = vpop.permute.xlu1 %2067  ;;  %v2086_v24 = vmul.f32 %v2081_v22, %v4827_v27  ;;  %v4345_v54 = vpack.c.bf16 %v2126_v14, %v2122_v47  ;;  %v2079_v17 = vsel %vm55_vm1, %v2066_v34, %v5344_v19 }
 0x295   :  { %v2082_v9 = vsel %vm55_vm1, %v5342_v4, %v2068_v1  ;;  %v2080_v37 = vsel %vm55_vm1, %v2068_v1, %v5348_v20 }
 0x296   :  { %v2074_v53 = vpop.permute.xlu0 %2073  ;;  %v2090_v23 = vmul.f32 %v2082_v9, %v4827_v27  ;;  %4344 = vmatpush1.bf16.msra.mxu0 %v4343_v25  ;;  %4346 = vmatprep.subr.bf16.mxu1 %v4345_v54  ;;  %v2091_v10 = vmul.f32 %v2080_v37, %v4856_v43 }
 0x297   :  { %v2077_v58 = vsel %vm55_vm1, %v5344_v19, %v2074_v53  ;;  %v2083_v21 = vsel %vm55_vm1, %v2074_v53, %v5336_v3  ;;  %4348 = vmatpush1.bf16.msra.mxu1 %v4347_v15  ;;  %v2087_v19 = vmul.f32 %v2079_v17, %v4856_v43 }
 0x298   :  { %v2076_v36 = vpop.permute.xlu1 %2075  ;;  %v2085_v3 = vmul.f32 %v2083_v21, %v4852_v41  ;;  %v2088_v27 = vmul.f32 %v2077_v58, %v4847_v40  ;;  %v4349_v2 = vpack.c.bf16 %v2090_v23, %v2086_v24  ;;  %v2093_v58 = vld [vmem:[%s5894_s2] sm:$0xff] }
 0x299   :  { %v2078_v34 = vsel %vm55_vm1, %v5348_v20, %v2076_v36  ;;  %v2084_v7 = vsel %vm55_vm1, %v2076_v36, %v5342_v4  ;;  %4287 = vmatmul.mubr.msk.f32.vlgmr.msra.gmra.mrb[4].mxu0 %vm2130_vm9, %v4285_v8  ;;  %v4286_v20 = vld [vmem:[%s5894_s2 + $0x18] sm:$0xff]  ;;  %v5953_v4 = vmov 0.0   ;;  %v4355_v53 = vpack.c.bf16 %v2091_v10, %v2087_v19 }
 0x29a   :  { %v2456_v47 = vpop.permute.xlu0 %2455  ;;  %v2089_v22 = vmul.f32 %v2084_v7, %v4852_v41  ;;  %v2092_v45 = vmul.f32 %v2078_v34, %v4847_v40  ;;  %4289 = vmatmul.mubr.msk.f32.vlgmr.msra.gmra.mrb[4].mxu1 %vm2130_vm9, %v4285_v8  ;;  %4350 = vmatprep.subr.bf16.mxu0 %v4349_v2 }
 0x29b   :  { %v2471_v57 = vsel %vm457_vm3, %v5350_v35, %v2456_v47  ;;  %2207 = vmatprep.mubr.f32.mxu0 %v5953_v4  ;;  %2284 = vmatprep.mubr.f32.mxu1 %v5953_v4  ;;  %v2469_v9 = vsel %vm457_vm3, %v2456_v47, %v5354_v60 }
 0x29c   :  { %v4351_v14 = vpack.c.bf16 %v2089_v22, %v2085_v3  ;;  %v2458_v25 = vpop.permute.xlu1 %2457  ;;  %v2476_v1 = vmul.f32 %v2471_v57, %v4873_v51  ;;  %v4353_v43 = vpack.c.bf16 %v2092_v45, %v2088_v27  ;;  %v2477_v8 = vmul.f32 %v2469_v9, %v4895_v61 }
 0x29d   :  { %v2472_v40 = vsel %vm457_vm3, %v5352_v48, %v2458_v25  ;;  %4288 = vmatmul.mubr.msk.f32.gmra.mrb[6].mxu0 %vm2130_vm9, %v4286_v20  ;;  %v2470_v21 = vsel %vm457_vm3, %v2458_v25, %v5356_v46 }
 0x29e   :  { %v2464_v24 = vpop.permute.xlu0 %2463  ;;  %v2480_v15 = vmul.f32 %v2472_v40, %v4873_v51  ;;  %4290 = vmatmul.mubr.msk.f32.gmra.mrb[6].mxu1 %vm2130_vm9, %v4286_v20  ;;  %4352 = vmatpush1.bf16.msra.mxu0 %v4351_v14  ;;  %v2481_v27 = vmul.f32 %v2470_v21, %v4895_v61  ;;  %v4295_v20 = vld [vmem:[%s5894_s2 + $0x20] sm:$0xff]  ;;  %v4377_v21 = vpack.c.bf16 %v5268_v63, %v5260_v0 }
 0x29f   :  { %v2467_v41 = vsel %vm457_vm3, %v5354_v60, %v2464_v24  ;;  %v2473_v54 = vsel %vm457_vm3, %v2464_v24, %v5350_v35  ;;  %4354 = vmatprep.subr.bf16.mxu1 %v4353_v43  ;;  %2361 = vmatprep.mubr.f32.mxu0 %v5953_v4  ;;  %v4379_v63 = vpack.c.bf16 %v5200_v33, %v5192_v6 }
 0x2a0   :  { %4356 = vmatpush1.bf16.msra.mxu1 %v4355_v53  ;;  %v2466_v51 = vpop.permute.xlu1 %2465  ;;  %v2475_v35 = vmul.f32 %v2473_v54, %v4889_v59  ;;  %v2478_v60 = vmul.f32 %v2467_v41, %v4898_v62  ;;  %2438 = vmatprep.mubr.f32.mxu1 %v5953_v4  ;;  %v4357_v23 = vpack.c.bf16 %v2480_v15, %v2476_v1  ;;  %v4296_v15 = vld [vmem:[%s5894_s2 + $0x28] sm:$0xff] }
 0x2a1   :  { %v2468_v37 = vsel %vm457_vm3, %v5356_v46, %v2466_v51  ;;  %v2474_v36 = vsel %vm457_vm3, %v2466_v51, %v5352_v48  ;;  %4291 = vmatmul.mubr.msk.f32.vlgmr.msra.gmra.mrb[4].mxu0 %vm2130_vm9, %v2093_v58  ;;  %v2094_v46 = vld [vmem:[%s5894_s2 + $0x8] sm:$0xff]  ;;  %v4363_v10 = vpack.c.bf16 %v2481_v27, %v2477_v8  ;;  %v4307_v27 = vld [vmem:[%s5894_s2 + $0x40] sm:$0xff] }
 0x2a2   :  { %v2659_v17 = vpop.permute.xlu0 %2658  ;;  %v2479_v2 = vmul.f32 %v2474_v36, %v4889_v59  ;;  %v2482_v47 = vmul.f32 %v2468_v37, %v4898_v62  ;;  %4358 = vmatprep.subr.bf16.mxu0 %v4357_v23  ;;  %2367 = vmatprep.mubr.f32.mxu0 %v5953_v4 }
 0x2a3   :  { %v2674_v3 = vsel %vm666_vm4, %v5358_v16, %v2659_v17  ;;  %4293 = vmatmul.mubr.msk.f32.vlgmr.msra.gmra.mrb[4].mxu1 %vm2130_vm9, %v2093_v58  ;;  %v2672_v45 = vsel %vm666_vm4, %v2659_v17, %v5368_v18  ;;  %v4301_v58 = vld [vmem:[%s5894_s2 + $0x30] sm:$0xff] }
 0x2a4   :  { %v4359_v48 = vpack.c.bf16 %v2479_v2, %v2475_v35  ;;  %v2661_v19 = vpop.permute.xlu1 %2660  ;;  %v2679_v34 = vmul.f32 %v2674_v3, %v4915_v11  ;;  %2444 = vmatprep.mubr.f32.mxu1 %v5953_v4  ;;  %v4361_v61 = vpack.c.bf16 %v2482_v47, %v2478_v60  ;;  %v2680_v43 = vmul.f32 %v2672_v45, %v4937_v31  ;;  %v5957_v45 = vld [vmem:[#allocation5_spill] sm:$0xff] }
 0x2a5   :  { %v2675_v59 = vsel %vm666_vm4, %v5366_v56, %v2661_v19  ;;  %4292 = vmatmul.mubr.msk.f32.gmra.mrb[6].mxu0 %vm2130_vm9, %v2094_v46  ;;  %v2673_v14 = vsel %vm666_vm4, %v2661_v19, %v5370_v30  ;;  %v5954_v19 = vld [vmem:[#allocation19_spill] sm:$0xff] }
 0x2a6   :  { %v2667_v7 = vpop.permute.xlu0 %2666  ;;  %v2683_v22 = vmul.f32 %v2675_v59, %v4915_v11  ;;  %4360 = vmatpush1.bf16.msra.mxu0 %v4359_v48  ;;  %4362 = vmatprep.subr.bf16.mxu1 %v4361_v61  ;;  %v2684_v41 = vmul.f32 %v2673_v14, %v4937_v31  ;;  %v5955_v61 = vld [vmem:[#allocation17_spill] sm:$0xff]  ;;  %v5958_v14 = vld [vmem:[#allocation20_spill] sm:$0xff] }
 0x2a7   :  { %v2670_v62 = vsel %vm666_vm4, %v5368_v18, %v2667_v7  ;;  %v2676_v57 = vsel %vm666_vm4, %v2667_v7, %v5358_v16  ;;  %4294 = vmatmul.mubr.msk.f32.gmra.mrb[6].mxu1 %vm2130_vm9, %v2094_v46  ;;  %2556 = vmatprep.mubr.f32.mxu0 %v5953_v4 }
 0x2a8   :  { %4364 = vmatpush1.bf16.msra.mxu1 %v4363_v10  ;;  %v2669_v11 = vpop.permute.xlu1 %2668  ;;  %v2678_v16 = vmul.f32 %v2676_v57, %v4931_v29  ;;  %v2681_v18 = vmul.f32 %v2670_v62, %v4940_v32  ;;  %2633 = vmatprep.mubr.f32.mxu1 %v5953_v4  ;;  %v4365_v25 = vpack.c.bf16 %v2683_v22, %v2679_v34  ;;  %v5956_v10 = vld [vmem:[#allocation7_spill] sm:$0xff] }
 0x2a9   :  { %v2671_v24 = vsel %vm666_vm4, %v5370_v30, %v2669_v11  ;;  %v2677_v40 = vsel %vm666_vm4, %v2669_v11, %v5366_v56  ;;  %4297 = vmatmul.mubr.msk.f32.vlgmr.msra.gmra.mrb[4].mxu0 %vm2130_vm9, %v4295_v20 }
 0x2aa   :  { %v5543_v1 = vpop.permute.xlu0 %3637  ;;  %v2682_v54 = vmul.f32 %v2677_v40, %v4931_v29  ;;  %v2685_v53 = vmul.f32 %v2671_v24, %v4940_v32  ;;  %4366 = vmatprep.subr.bf16.mxu0 %v4365_v25  ;;  %2562 = vmatprep.mubr.f32.mxu0 %v5953_v4  ;;  %v4373_v29 = vpack.c.bf16 %v5262_v28, %v5254_v38 }
 0x2ab   :  { %4299 = vmatmul.mubr.msk.f32.vlgmr.msra.gmra.mrb[4].mxu1 %vm2130_vm9, %v4295_v20  ;;  %v4371_v32 = vpack.c.bf16 %v2684_v41, %v2680_v43  ;;  %v4375_v38 = vpack.c.bf16 %v5194_v13, %v5188_v26  ;;  %v4302_v26 = vld [vmem:[%s5894_s2 + $0x38] sm:$0xff]  ;;  %v4313_v41 = vld [vmem:[%s5894_s2 + $0x50] sm:$0xff] }
 0x2ac   :  { %v4367_v30 = vpack.c.bf16 %v2682_v54, %v2678_v16  ;;  %v5561_v9 = vpop.permute.xlu1 %3639  ;;  %2639 = vmatprep.mubr.f32.mxu1 %v5953_v4  ;;  %v4369_v56 = vpack.c.bf16 %v2685_v53, %v2681_v18  ;;  %v5959_v16 = vld [vmem:[#allocation18_spill] sm:$0xff]  ;;  %v5960_v54 = vld [vmem:[#allocation8_spill] sm:$0xff] }
 0x2ad   :  { %4298 = vmatmul.mubr.msk.f32.gmra.mrb[6].mxu0 %vm2130_vm9, %v4296_v15 }
 0x2ae   :  { %v5564_v31 = vpop.permute.xlu0 %3645  ;;  %4368 = vmatpush1.bf16.msra.mxu0 %v4367_v30  ;;  %4370 = vmatprep.subr.bf16.mxu1 %v4369_v56  ;;  %v5961_v56 = vld [vmem:[#allocation6_spill] sm:$0xff] }
 0x2af   :  { %4300 = vmatmul.mubr.msk.f32.gmra.mrb[6].mxu1 %vm2130_vm9, %v4296_v15  ;;  %4374 = vmatprep.subr.bf16.mxu0 %v4373_v29 }
 0x2b0   :  { %4372 = vmatpush1.bf16.msra.mxu1 %v4371_v32  ;;  %v5575_v51 = vpop.permute.xlu1 %3647  ;;  %2759 = vmatprep.mubr.f32.mxu0 %v5953_v4 }
 0x2b1   :  { %4378 = vmatprep.subr.bf16.mxu1 %v4377_v21  ;;  %4303 = vmatmul.mubr.msk.f32.vlgmr.msra.gmra.mrb[4].mxu0 %vm2130_vm9, %v4301_v58 }
 0x2b2   :  { %v3033_v28 = vpop.permute.xlu0 %3032  ;;  %2836 = vmatprep.mubr.f32.mxu1 %v5953_v4  ;;  %4376 = vmatpush1.bf16.msra.mxu0 %v4375_v38 }
 0x2b3   :  { %v3046_v35 = vsel %vm1046_vm5, %v3033_v28, %v5376_v42  ;;  %v3048_v0 = vsel %vm1046_vm5, %v5372_v39, %v3033_v28  ;;  %4305 = vmatmul.mubr.msk.f32.vlgmr.msra.gmra.mrb[4].mxu1 %vm2130_vm9, %v4301_v58  ;;  %2765 = vmatprep.mubr.f32.mxu0 %v5953_v4  ;;  %v5962_v28 = vld [vmem:[#allocation23_spill] sm:$0xff] }
 0x2b4   :  { %4380 = vmatpush1.bf16.msra.mxu1 %v4379_v63  ;;  %v3035_v13 = vpop.permute.xlu1 %3034  ;;  %v3052_v60 = vmul.f32 %v3048_v0, %v4977_v52  ;;  %v3053_v23 = vmul.f32 %v3046_v35, %v4971_v49  ;;  %2842 = vmatprep.mubr.f32.mxu1 %v5953_v4  ;;  %v5963_v0 = vld [vmem:[#allocation21_spill] sm:$0xff] }
 0x2b5   :  { %v3047_v6 = vsel %vm1046_vm5, %v3035_v13, %v5378_v5  ;;  %v3049_v33 = vsel %vm1046_vm5, %v5374_v44, %v3035_v13  ;;  %4304 = vmatmul.mubr.msk.f32.gmra.mrb[6].mxu0 %vm2130_vm9, %v4302_v26 }
 0x2b6   :  { %v3041_v17 = vpop.permute.xlu0 %3040  ;;  %v3056_v36 = vmul.f32 %v3049_v33, %v4977_v52  ;;  %v3057_v3 = vmul.f32 %v3047_v6, %v4971_v49  ;;  %2930 = vmatprep.mubr.f32.mxu0 %v5953_v4  ;;  %v5964_v6 = vld [vmem:[#allocation11_spill] sm:$0xff] }
 0x2b7   :  { %v3044_v8 = vsel %vm1046_vm5, %v5376_v42, %v3041_v17  ;;  %v3050_v37 = vsel %vm1046_vm5, %v3041_v17, %v5372_v39  ;;  %4306 = vmatmul.mubr.msk.f32.gmra.mrb[6].mxu1 %vm2130_vm9, %v4302_v26 }
 0x2b8   :  { %v4383_v2 = vpack.c.bf16 %v3056_v36, %v3052_v60  ;;  %v3043_v47 = vpop.permute.xlu1 %3042  ;;  %v3054_v42 = vmul.f32 %v3044_v8, %v4987_v55  ;;  %v3055_v46 = vmul.f32 %v3050_v37, %v4974_v50  ;;  %3007 = vmatprep.mubr.f32.mxu1 %v5953_v4  ;;  %v4381_v39 = vpack.c.bf16 %v3057_v3, %v3053_v23  ;;  %v4314_v60 = vld [vmem:[%s5894_s2 + $0x58] sm:$0xff]  ;;  %v5965_v8 = vld [vmem:[#allocation9_spill] sm:$0xff] }
 0x2b9   :  { %v3045_v49 = vsel %vm1046_vm5, %v5378_v5, %v3043_v47  ;;  %v3051_v48 = vsel %vm1046_vm5, %v3043_v47, %v5374_v44  ;;  %4309 = vmatmul.mubr.msk.f32.vlgmr.msra.gmra.mrb[4].mxu0 %vm2130_vm9, %v4307_v27  ;;  %v4308_v44 = vld [vmem:[%s5894_s2 + $0x48] sm:$0xff] }
 0x2ba   :  { %v3236_v52 = vpop.permute.xlu0 %3235  ;;  %v3058_v59 = vmul.f32 %v3045_v49, %v4987_v55  ;;  %v3059_v62 = vmul.f32 %v3051_v48, %v4974_v50  ;;  %4382 = vmatprep.subr.bf16.mxu0 %v4381_v39  ;;  %2936 = vmatprep.mubr.f32.mxu0 %v5953_v4  ;;  %v5967_v47 = vld [vmem:[#allocation22_spill] sm:$0xff]  ;;  %v4319_v48 = vld [vmem:[%s5894_s2 + $0x60] sm:$0xff] }
 0x2bb   :  { %v3249_v34 = vsel %vm1255_vm6, %v3236_v52, %v5954_v19  ;;  %v3251_v7 = vsel %vm1255_vm6, %v5955_v61, %v3236_v52  ;;  %4311 = vmatmul.mubr.msk.f32.vlgmr.msra.gmra.mrb[4].mxu1 %vm2130_vm9, %v4307_v27  ;;  %4384 = vmatpush1.bf16.msra.mxu0 %v4383_v2  ;;  %v5966_v27 = vld [vmem:[#allocation24_spill] sm:$0xff] }
 0x2bc   :  { %v4387_v5 = vpack.c.bf16 %v3058_v59, %v3054_v42  ;;  %v3238_v57 = vpop.permute.xlu1 %3237  ;;  %v3255_v22 = vmul.f32 %v3251_v7, %v5956_v10  ;;  %v3256_v20 = vmul.f32 %v3249_v34, %v5957_v45  ;;  %3013 = vmatprep.mubr.f32.mxu1 %v5953_v4  ;;  %v4385_v55 = vpack.c.bf16 %v3059_v62, %v3055_v46  ;;  %v5969_v59 = vld [vmem:[#allocation10_spill] sm:$0xff] }
 0x2bd   :  { %v3250_v11 = vsel %vm1255_vm6, %v3238_v57, %v5958_v14  ;;  %v3252_v18 = vsel %vm1255_vm6, %v5959_v16, %v3238_v57  ;;  %4310 = vmatmul.mubr.msk.f32.gmra.mrb[6].mxu0 %vm2130_vm9, %v4308_v44 }
 0x2be   :  { %v3244_v50 = vpop.permute.xlu0 %3243  ;;  %v3259_v24 = vmul.f32 %v3252_v18, %v5956_v10  ;;  %v3260_v40 = vmul.f32 %v3250_v11, %v5957_v45  ;;  %4386 = vmatprep.subr.bf16.mxu1 %v4385_v55  ;;  %3133 = vmatprep.mubr.f32.mxu0 %v5953_v4 }
 0x2bf   :  { %v3247_v25 = vsel %vm1255_vm6, %v5954_v19, %v3244_v50  ;;  %v3253_v43 = vsel %vm1255_vm6, %v3244_v50, %v5955_v61  ;;  %4312 = vmatmul.mubr.msk.f32.gmra.mrb[6].mxu1 %vm2130_vm9, %v4308_v44  ;;  %v5968_v19 = vld [vmem:[#allocation12_spill] sm:$0xff]  ;;  %v4320_v50 = vld [vmem:[%s5894_s2 + $0x68] sm:$0xff] }
 0x2c0   :  { %v3257_v53 = vmul.f32 %v3247_v25, %v5960_v54  ;;  %v4391_v15 = vpack.c.bf16 %v3259_v24, %v3255_v22  ;;  %4388 = vmatpush1.bf16.msra.mxu1 %v4387_v5  ;;  %v3246_v30 = vpop.permute.xlu1 %3245  ;;  %v3258_v29 = vmul.f32 %v3253_v43, %v5961_v56  ;;  %3210 = vmatprep.mubr.f32.mxu1 %v5953_v4  ;;  %v5971_v25 = vld [vmem:[#allocation13_spill] sm:$0xff] }
 0x2c1   :  { %v4389_v32 = vpack.c.bf16 %v3260_v40, %v3256_v20  ;;  %v3248_v21 = vsel %vm1255_vm6, %v5958_v14, %v3246_v30  ;;  %v3254_v38 = vsel %vm1255_vm6, %v3246_v30, %v5959_v16  ;;  %4315 = vmatmul.mubr.msk.f32.vlgmr.msra.gmra.mrb[4].mxu0 %vm2130_vm9, %v4313_v41  ;;  %v5970_v16 = vld [vmem:[#allocation15_spill] sm:$0xff] }
 0x2c2   :  { %v3439_v58 = vpop.permute.xlu0 %3438  ;;  %v3261_v26 = vmul.f32 %v3248_v21, %v5960_v54  ;;  %v3262_v13 = vmul.f32 %v3254_v38, %v5961_v56  ;;  %3139 = vmatprep.mubr.f32.mxu0 %v5953_v4  ;;  %v5973_v38 = vld [vmem:[#allocation14_spill] sm:$0xff] }
 0x2c3   :  { %v3452_v35 = vsel %vm1464_vm7, %v3439_v58, %v5962_v28  ;;  %v3454_v63 = vsel %vm1464_vm7, %v5963_v0, %v3439_v58  ;;  %4390 = vmatprep.subr.bf16.mxu0 %v4389_v32  ;;  %4317 = vmatmul.mubr.msk.f32.vlgmr.msra.gmra.mrb[4].mxu1 %vm2130_vm9, %v4313_v41  ;;  %v5972_v32 = vld [vmem:[#allocation16_spill] sm:$0xff] }
 0x2c4   :  { %4392 = vmatpush1.bf16.msra.mxu0 %v4391_v15  ;;  %v4395_v23 = vpack.c.bf16 %v3261_v26, %v3257_v53  ;;  %v3441_v17 = vpop.permute.xlu1 %3440  ;;  %v3458_v33 = vmul.f32 %v3454_v63, %v5964_v6  ;;  %v3459_v37 = vmul.f32 %v3452_v35, %v5965_v8  ;;  %3216 = vmatprep.mubr.f32.mxu1 %v5953_v4 }
 0x2c5   :  { %v4393_v36 = vpack.c.bf16 %v3262_v13, %v3258_v29  ;;  %v3453_v2 = vsel %vm1464_vm7, %v3441_v17, %v5966_v27  ;;  %v3455_v42 = vsel %vm1464_vm7, %v5967_v47, %v3441_v17  ;;  %4316 = vmatmul.mubr.msk.f32.gmra.mrb[6].mxu0 %vm2130_vm9, %v4314_v60  ;;  %v4325_v29 = vld [vmem:[%s5894_s2 + $0x70] sm:$0xff]  ;;  %v4326_v13 = vld [vmem:[%s5894_s2 + $0x78] sm:$0xff]  ;;  %v4332_v17 = vld [vmem:[%s5894_s2 + $0x88] sm:$0xff] }
 0x2c6   :  { %v3447_v3 = vpop.permute.xlu0 %3446  ;;  %v3462_v52 = vmul.f32 %v3455_v42, %v5964_v6  ;;  %v3463_v49 = vmul.f32 %v3453_v2, %v5965_v8  ;;  %3336 = vmatprep.mubr.f32.mxu0 %v5953_v4  ;;  %v4624_v6 = vld [vmem:[%s5892_s0] sm:$0xff] }
 0x2c7   :  { %v3450_v46 = vsel %vm1464_vm7, %v5962_v28, %v3447_v3  ;;  %v3456_v39 = vsel %vm1464_vm7, %v3447_v3, %v5963_v0  ;;  %4394 = vmatprep.subr.bf16.mxu1 %v4393_v36  ;;  %4318 = vmatmul.mubr.msk.f32.gmra.mrb[6].mxu1 %vm2130_vm9, %v4314_v60  ;;  %v4331_v60 = vld [vmem:[%s5894_s2 + $0x80] sm:$0xff] }
 0x2c8   :  { %v3460_v34 = vmul.f32 %v3450_v46, %v5968_v19  ;;  %v4399_v61 = vpack.c.bf16 %v3462_v52, %v3458_v33  ;;  %4396 = vmatpush1.bf16.msra.mxu1 %v4395_v23  ;;  %v3449_v7 = vpop.permute.xlu1 %3448  ;;  %v3461_v62 = vmul.f32 %v3456_v39, %v5969_v59  ;;  %3413 = vmatprep.mubr.f32.mxu1 %v5953_v4  ;;  %v4623_v23 = vld [vmem:[%s5892_s0 + $0x18] sm:$0xff]  ;;  %v4625_v33 = vld [vmem:[%s5892_s0 + $0x10] sm:$0xff]  ;;  %v3984_v8 = vld [vmem:[%s5895_s3] sm:$0xff] }
 0x2c9   :  { %v4397_v44 = vpack.c.bf16 %v3463_v49, %v3459_v37  ;;  %v3451_v57 = vsel %vm1464_vm7, %v5966_v27, %v3449_v7  ;;  %v3457_v10 = vsel %vm1464_vm7, %v3449_v7, %v5967_v47  ;;  %4321 = vmatmul.mubr.msk.f32.vlgmr.msra.gmra.mrb[4].mxu0 %vm2130_vm9, %v4319_v48  ;;  %v3985_v37 = vld [vmem:[%s5895_s3 + $0x8] sm:$0xff] }
 0x2ca   :  { %v3642_v5 = vpop.permute.xlu0 %3641  ;;  %v3464_v20 = vmul.f32 %v3451_v57, %v5968_v19  ;;  %v3465_v55 = vmul.f32 %v3457_v10, %v5969_v59  ;;  %3342 = vmatprep.mubr.f32.mxu0 %v5953_v4 }
 0x2cb   :  { %v3655_v22 = vsel %vm1673_vm8, %v3642_v5, %v5564_v31  ;;  %v3657_v45 = vsel %vm1673_vm8, %v5543_v1, %v3642_v5  ;;  %4398 = vmatprep.subr.bf16.mxu0 %v4397_v44  ;;  %4323 = vmatmul.mubr.msk.f32.vlgmr.msra.gmra.mrb[4].mxu1 %vm2130_vm9, %v4319_v48 }
 0x2cc   :  { %4400 = vmatpush1.bf16.msra.mxu0 %v4399_v61  ;;  %v4403_v14 = vpack.c.bf16 %v3464_v20, %v3460_v34  ;;  %v3644_v11 = vpop.permute.xlu1 %3643  ;;  %v3661_v18 = vmul.f32 %v3657_v45, %v5970_v16  ;;  %v3662_v43 = vmul.f32 %v3655_v22, %v5971_v25  ;;  %3419 = vmatprep.mubr.f32.mxu1 %v5953_v4 }
 0x2cd   :  { %v4401_v24 = vpack.c.bf16 %v3465_v55, %v3461_v62  ;;  %v3656_v41 = vsel %vm1673_vm8, %v3644_v11, %v5575_v51  ;;  %v3658_v54 = vsel %vm1673_vm8, %v5561_v9, %v3644_v11  ;;  %4322 = vmatmul.mubr.msk.f32.gmra.mrb[6].mxu0 %vm2130_vm9, %v4320_v50 }
 0x2ce   :  { %v3650_v40 = vpop.permute.xlu0 %3649  ;;  %v3665_v30 = vmul.f32 %v3658_v54, %v5970_v16  ;;  %v3666_v56 = vmul.f32 %v3656_v41, %v5971_v25  ;;  %3539 = vmatprep.mubr.f32.mxu0 %v5953_v4 }
 0x2cf   :  { %v3653_v53 = vsel %vm1673_vm8, %v5564_v31, %v3650_v40  ;;  %v3659_v15 = vsel %vm1673_vm8, %v3650_v40, %v5543_v1  ;;  %4402 = vmatprep.subr.bf16.mxu1 %v4401_v24  ;;  %4324 = vmatmul.mubr.msk.f32.gmra.mrb[6].mxu1 %vm2130_vm9, %v4320_v50 }
 0x2d0   :  { %v3663_v58 = vmul.f32 %v3653_v53, %v5972_v32  ;;  %v4407_v31 = vpack.c.bf16 %v3665_v30, %v3661_v18  ;;  %4404 = vmatpush1.bf16.msra.mxu1 %v4403_v14  ;;  %v3652_v21 = vpop.permute.xlu1 %3651  ;;  %v3664_v1 = vmul.f32 %v3659_v15, %v5973_v38  ;;  %3616 = vmatprep.mubr.f32.mxu1 %v5953_v4 }
 0x2d1   :  { %v4405_v28 = vpack.c.bf16 %v3666_v56, %v3662_v43  ;;  %v3654_v35 = vsel %vm1673_vm8, %v5575_v51, %v3652_v21  ;;  %v3660_v0 = vsel %vm1673_vm8, %v3652_v21, %v5561_v9  ;;  %4327 = vmatmul.mubr.msk.f32.vlgmr.msra.gmra.mrb[4].mxu0 %vm2130_vm9, %v4325_v29  ;;  %v4622_v9 = vld [vmem:[%s5892_s0 + $0x8] sm:$0xff]  ;;  %s4666_s0 = smov [#allocation2]  }
 0x2d2   :  { %v3667_v63 = vmul.f32 %v3654_v35, %v5972_v32  ;;  %v3668_v26 = vmul.f32 %v3660_v0, %v5973_v38  ;;  %3545 = vmatprep.mubr.f32.mxu0 %v5953_v4  ;;  %s4215_s3 = sshll.u32 %s4666_s0, 4  ;;  %s4216_s3 = int_to_ptr.vmem [resolvable:$true] %s4215_s3 }
 0x2d3   :  { %4406 = vmatprep.subr.bf16.mxu0 %v4405_v28  ;;  %4329 = vmatmul.mubr.msk.f32.vlgmr.msra.gmra.mrb[4].mxu1 %vm2130_vm9, %v4325_v29  ;;  %s4626_s17 = scalar_lea.vmem %s4216_s3, 1024  ;;  %p4631_p1 = scmp.lt.s32.totalorder %s4216_s3, %s4216_s3 }
 0x2d4   :  { %4408 = vmatpush1.bf16.msra.mxu0 %v4407_v31  ;;  %v4411_v51 = vpack.c.bf16 %v3667_v63, %v3663_v58  ;;  %3622 = vmatprep.mubr.f32.mxu1 %v5953_v4  ;;  %v4409_v12 = vpack.c.bf16 %v3668_v26, %v3664_v1  ;;  %p4627_p0 = scmp.ne.s32.totalorder %s4216_s3, %s4626_s17  ;;  %p4632_p2 = scmp.lt.s32.totalorder %s4626_s17, %s4626_s17 }
 0x2d5   :  { %4000 = vmatprep.subr.mxu0 %v4622_v9  ;;  %4328 = vmatmul.mubr.msk.f32.gmra.mrb[6].mxu0 %vm2130_vm9, %v4326_v13 }
 0x2d6   :  { %4410 = vmatprep.subr.bf16.mxu1 %v4409_v12  ;;  %3742 = vmatprep.mubr.f32.mxu0 %v5953_v4  ;;  %p4633_p3 = por %p4632_p2, %p4631_p1 }
 0x2d7   :  { %4330 = vmatmul.mubr.msk.f32.gmra.mrb[6].mxu1 %vm2130_vm9, %v4326_v13 }
 0x2d8   :  { %4412 = vmatpush1.bf16.msra.mxu1 %v4411_v51  ;;  %3819 = vmatprep.mubr.f32.mxu1 %v5953_v4  ;;  %p4634_p4 = pnand %p4633_p3, %p4627_p0 }
 0x2d9   :  { %4333 = vmatmul.mubr.msk.f32.vlgmr.msra.gmra.mrb[4].mxu0 %vm2130_vm9, %v4331_v60  ;;  %4077 = vmatprep.subr.mxu1 %v4623_v23 }
 0x2da   :  { %3748 = vmatprep.mubr.f32.mxu0 %v5953_v4  ;;  %4001 = vmatpush1.msra.mxu0 %v4624_v6 }
 0x2db   :  { %4335 = vmatmul.mubr.msk.f32.vlgmr.msra.gmra.mrb[4].mxu1 %vm2130_vm9, %v4331_v60 }
 0x2dc   :  { %3825 = vmatprep.mubr.f32.mxu1 %v5953_v4  ;;  %4078 = vmatpush1.msra.mxu1 %v4625_v33 }
 0x2dd   :  { %4334 = vmatmul.mubr.msk.f32.gmra.mrb[6].mxu0 %vm2130_vm9, %v4332_v17 }
 0x2de   :  { %4064 = vmatprep.mubr.f32.mxu0 %v5953_v4 }
 0x2df   :  { %4336 = vmatmul.mubr.msk.f32.gmra.mrb[6].mxu1 %vm2130_vm9, %v4332_v17  ;;  %v3842_v3 = vpop.permute.xlu0 %3841 }
 0x2e0   :  { %4141 = vmatprep.mubr.f32.mxu1 %v5953_v4 }
 0x2e1   :  { %4337 = vmatmul.mubr.msk.f32.vlgmr.msra.gmra.mrb[8].mxu0 %vm128_vm2, %v3984_v8  ;;  %v3846_v47 = vpop.permute.xlu1 %3845 }
 0x2e2   :  { %4070 = vmatprep.mubr.f32.mxu0 %v5953_v4 }
 0x2e3   :  { %4339 = vmatmul.mubr.msk.f32.vlgmr.msra.gmra.mrb[8].mxu1 %vm128_vm2, %v3984_v8 }
 0x2e4   :  { %4147 = vmatprep.mubr.f32.mxu1 %v5953_v4 }
 0x2e5   :  { %4338 = vmatmul.mubr.msk.f32.gmra.mrb[10].mxu0 %vm128_vm2, %v3985_v37 }
 0x2e7   :  { %4340 = vmatmul.mubr.msk.f32.gmra.mrb[10].mxu1 %vm128_vm2, %v3985_v37 }
 0x3ac   :  { %v3744_v36 = vpop.f32.mrb[4].mxu0 }
 0x3ad   :  { %v3746_v27 = vpop.f32.mrb[5].mxu0  ;;  %v3848_v39 = vadd.f32 %v3842_v3, %v3744_v36 }
 0x3ae   :  { %v3821_v2 = vpop.f32.mrb[4].mxu1  ;;  %v3849_v48 = vadd.f32 %v3842_v3, %v3746_v27 }
 0x3af   :  { %v3823_v42 = vpop.f32.mrb[5].mxu1  ;;  %v3850_v61 = vadd.f32 %v3842_v3, %v3821_v2 }
 0x3b0   :  { %v3750_v46 = vpop.f32.mrb[6].mxu0  ;;  %v3851_v62 = vadd.f32 %v3842_v3, %v3823_v42 }
 0x3b1   :  { %v3852_v52 = vadd.f32 %v3846_v47, %v3750_v46  ;;  %v3752_v49 = vpop.f32.mrb[7].mxu0 }
 0x3b2   :  { %v3853_v19 = vadd.f32 %v3846_v47, %v3752_v49  ;;  %v3827_v34 = vpop.f32.mrb[6].mxu1 }
 0x3b3   :  { %v3856_v7 = vadd.f32 %v3852_v52, %v3848_v39  ;;  %v3854_v4 = vadd.f32 %v3846_v47, %v3827_v34  ;;  %v3829_v59 = vpop.f32.mrb[7].mxu1 }
 0x3b4   :  { %v3863_v44 = vadd.f32 %v3853_v19, %v3849_v48  ;;  %v3855_v5 = vadd.f32 %v3846_v47, %v3829_v59  ;;  %v5816_v57 = vpop.f32.mrb[8].mxu0 }
 0x3b5   :  { %v3857_v10 = vrot.slane %v3856_v7, 4  ;;  %v3870_v22 = vadd.f32 %v3854_v4, %v3850_v61  ;;  %v5818_v45 = vpop.f32.mrb[9].mxu0 }
 0x3b6   :  { %v3864_v20 = vrot.slane %v3863_v44, 4  ;;  %v3877_v55 = vadd.f32 %v3855_v5, %v3851_v62  ;;  %v5820_v50 = vpop.f32.mrb[8].mxu1 }
 0x3b7   :  { %v3858_v14 = vadd.f32 %v3857_v10, %v3856_v7  ;;  %v3871_v11 = vrot.slane %v3870_v22, 4  ;;  %v5822_v16 = vpop.f32.mrb[9].mxu1 }
 0x3b8   :  { %v3865_v18 = vadd.f32 %v3864_v20, %v3863_v44  ;;  %v3878_v25 = vrot.slane %v3877_v55, 4  ;;  %v5824_v43 = vpop.f32.mrb[10].mxu0 }
 0x3b9   :  { %v3859_v24 = vrot.slane %v3858_v14, 2  ;;  %v3872_v40 = vadd.f32 %v3871_v11, %v3870_v22  ;;  %v5826_v41 = vpop.f32.mrb[11].mxu0 }
 0x3ba   :  { %v3866_v54 = vrot.slane %v3865_v18, 2  ;;  %v3879_v53 = vadd.f32 %v3878_v25, %v3877_v55  ;;  %v5828_v15 = vpop.f32.mrb[10].mxu1 }
 0x3bb   :  { %v3860_v30 = vadd.f32 %v3859_v24, %v3858_v14  ;;  %v3873_v56 = vrot.slane %v3872_v40, 2  ;;  %v5830_v29 = vpop.f32.mrb[11].mxu1 }
 0x3bc   :  { %v3867_v32 = vadd.f32 %v3866_v54, %v3865_v18  ;;  %v3880_v58 = vrot.slane %v3879_v53, 2 }
 0x3bd   :  { %v3861_v31 = vrot.slane %v3860_v30, 1  ;;  %v3874_v21 = vadd.f32 %v3873_v56, %v3872_v40 }
 0x3be   :  { %v3868_v38 = vrot.slane %v3867_v32, 1  ;;  %v3881_v1 = vadd.f32 %v3880_v58, %v3879_v53 }
 0x3bf   :  { %v3862_v28 = vadd.f32 %v3861_v31, %v3860_v30  ;;  %v3875_v35 = vrot.slane %v3874_v21, 1  ;;  %v3954_v30 = vpop.permute.xlu1 %3953 }
 0x3c0   :  { %v3869_v0 = vadd.f32 %v3868_v38, %v3867_v32  ;;  %v3882_v63 = vrot.slane %v3881_v1, 1 }
 0x3c1   :  { %v3884_v26 = vmul.f32 0.0625, %v3862_v28  ;;  %v3876_v13 = vadd.f32 %v3875_v35, %v3874_v21 }
 0x3c2   :  { %v3885_v51 = vmul.f32 0.0625, %v3869_v0  ;;  %v3883_v12 = vadd.f32 %v3882_v63, %v3881_v1 }
 0x3c3   :  { %v5832_v9 = vsub.f32 %v3848_v39, %v3884_v26  ;;  %v5834_v60 = vsub.f32 %v3852_v52, %v3884_v26  ;;  %v3886_v23 = vmul.f32 0.0625, %v3876_v13  ;;  %v3970_v13 = vpop.permute.xlu1 %3969 }
 0x3c4   :  { %v5836_v17 = vsub.f32 %v3849_v48, %v3885_v51  ;;  %v5838_v6 = vsub.f32 %v3853_v19, %v3885_v51  ;;  %v3887_v33 = vmul.f32 0.0625, %v3883_v12 }
 0x3c5   :  { %v3896_v8 = vmul.f32 %v5832_v9, %v5832_v9  ;;  %v3900_v37 = vmul.f32 %v5834_v60, %v5834_v60  ;;  %v5844_v36 = vsub.f32 %v3850_v61, %v3886_v23  ;;  %v5846_v3 = vsub.f32 %v3854_v4, %v3886_v23  ;;  %v3958_v23 = vpop.permute.xlu0 %3957 }
 0x3c6   :  { %v3897_v27 = vmul.f32 %v5836_v17, %v5836_v17  ;;  %v3901_v2 = vmul.f32 %v5838_v6, %v5838_v6  ;;  %v5852_v47 = vsub.f32 %v3851_v62, %v3887_v33  ;;  %v5854_v42 = vsub.f32 %v3855_v5, %v3887_v33 }
 0x3c7   :  { %v3904_v46 = vadd.f32 %v3900_v37, %v3896_v8  ;;  %v3898_v39 = vmul.f32 %v5844_v36, %v5844_v36  ;;  %v3902_v52 = vmul.f32 %v5846_v3, %v5846_v3  ;;  %v3974_v33 = vpop.permute.xlu1 %3973 }
 0x3c8   :  { %v3911_v49 = vadd.f32 %v3901_v2, %v3897_v27  ;;  %v3899_v48 = vmul.f32 %v5852_v47, %v5852_v47  ;;  %v3903_v19 = vmul.f32 %v5854_v42, %v5854_v42 }
 0x3c9   :  { %v3905_v34 = vrot.slane %v3904_v46, 4  ;;  %v3918_v61 = vadd.f32 %v3902_v52, %v3898_v39  ;;  %v3988_v8 = vpop.permute.xlu0 %3987 }
 0x3ca   :  { %v3912_v7 = vrot.slane %v3911_v49, 4  ;;  %v3925_v4 = vadd.f32 %v3903_v19, %v3899_v48  ;;  %v4067_v2 = vadd.f32 %v5816_v57, %v3988_v8  ;;  %v4144_v48 = vadd.f32 %v5820_v50, %v3988_v8 }
 0x3cb   :  { %v3906_v59 = vadd.f32 %v3905_v34, %v3904_v46  ;;  %v3919_v62 = vrot.slane %v3918_v61, 4  ;;  %v3992_v37 = vpop.permute.xlu1 %3991  ;;  %v4069_v46 = vadd.f32 %v5818_v45, %v3988_v8  ;;  %v4146_v19 = vadd.f32 %v5822_v16, %v3988_v8 }
 0x3cc   :  { %v3913_v44 = vadd.f32 %v3912_v7, %v3911_v49  ;;  %v3926_v5 = vrot.slane %v3925_v4, 4  ;;  %v4075_v57 = vadd.f32 %v5826_v41, %v3992_v37 }
 0x3cd   :  { %v3907_v10 = vrot.slane %v3906_v59, 2  ;;  %v3920_v22 = vadd.f32 %v3919_v62, %v3918_v61 }
 0x3ce   :  { %v3914_v20 = vrot.slane %v3913_v44, 2  ;;  %v3927_v55 = vadd.f32 %v3926_v5, %v3925_v4  ;;  %v4073_v4 = vadd.f32 %v5824_v43, %v3992_v37 }
 0x3cf   :  { %v3908_v14 = vadd.f32 %v3907_v10, %v3906_v59  ;;  %v3921_v11 = vrot.slane %v3920_v22, 2 }
 0x3d0   :  { %v3915_v18 = vadd.f32 %v3914_v20, %v3913_v44  ;;  %v3928_v25 = vrot.slane %v3927_v55, 2 }
 0x3d1   :  { %v3909_v24 = vrot.slane %v3908_v14, 1  ;;  %v3922_v40 = vadd.f32 %v3921_v11, %v3920_v22 }
 0x3d2   :  { %v3916_v54 = vrot.slane %v3915_v18, 1  ;;  %v3929_v53 = vadd.f32 %v3928_v25, %v3927_v55 }
 0x3d3   :  { %v3910_v56 = vadd.f32 %v3909_v24, %v3908_v14  ;;  %v3923_v32 = vrot.slane %v3922_v40, 1 }
 0x3d4   :  { %v3917_v58 = vadd.f32 %v3916_v54, %v3915_v18  ;;  %v3930_v31 = vrot.slane %v3929_v53, 1 }
 0x3d5   :  { %v3932_v21 = vmul.f32 0.0625, %v3910_v56  ;;  %v3924_v38 = vadd.f32 %v3923_v32, %v3922_v40 }
 0x3d6   :  { %v3933_v1 = vmul.f32 0.0625, %v3917_v58  ;;  %v3931_v28 = vadd.f32 %v3930_v31, %v3929_v53 }
 0x3d7   :  { %v3936_v35 = vadd.f32 1e-05, %v3932_v21  ;;  %v3934_v0 = vmul.f32 0.0625, %v3924_v38 }
 0x3d8   :  { %v3937_v63 = vadd.f32 1e-05, %v3933_v1  ;;  %v3935_v26 = vmul.f32 0.0625, %v3931_v28 }
 0x3d9   :  { %4596 = vrsqrt.f32 %v3936_v35  ;;  %v3938_v51 = vadd.f32 1e-05, %v3934_v0 }
 0x3da   :  { %4598 = vrsqrt.f32 %v3937_v63  ;;  %v3939_v12 = vadd.f32 1e-05, %v3935_v26 }
 0x3db   :  { %4600 = vrsqrt.f32 %v3938_v51 }
 0x3dc   :  { %4602 = vrsqrt.f32 %v3939_v12 }
 0x3e3   :  { %v4597_v27 = vpop.eup %4596 }
 0x3e4   :  { %v4599_v39 = vpop.eup %4598  ;;  %v3948_v52 = vmul.f32 %v4597_v27, %v5834_v60  ;;  %v3944_v49 = vmul.f32 %v4597_v27, %v5832_v9 }
 0x3e5   :  { %v4601_v34 = vpop.eup %4600  ;;  %v3949_v61 = vmul.f32 %v4599_v39, %v5838_v6  ;;  %v3945_v7 = vmul.f32 %v4599_v39, %v5836_v17 }
 0x3e6   :  { %v4603_v59 = vpop.eup %4602  ;;  %v3950_v45 = vmul.f32 %v4601_v34, %v5846_v3  ;;  %v3946_v60 = vmul.f32 %v4601_v34, %v5844_v36  ;;  %v3960_v62 = vmul.f32 %v3954_v30, %v3944_v49  ;;  %v3964_v9 = vmul.f32 %v3958_v23, %v3948_v52 }
 0x3e7   :  { %v3951_v50 = vmul.f32 %v4603_v59, %v5854_v42  ;;  %v3947_v16 = vmul.f32 %v4603_v59, %v5852_v47  ;;  %v3961_v44 = vmul.f32 %v3954_v30, %v3945_v7  ;;  %v3965_v5 = vmul.f32 %v3958_v23, %v3949_v61 }
 0x3e8   :  { %v3962_v6 = vmul.f32 %v3954_v30, %v3946_v60  ;;  %v3976_v10 = vadd.f32 %v3970_v13, %v3960_v62  ;;  %v3966_v17 = vmul.f32 %v3958_v23, %v3950_v45  ;;  %v3980_v22 = vadd.f32 %v3974_v33, %v3964_v9 }
 0x3e9   :  { %v3963_v43 = vmul.f32 %v3954_v30, %v3947_v16  ;;  %v3977_v20 = vadd.f32 %v3970_v13, %v3961_v44  ;;  %v3967_v41 = vmul.f32 %v3958_v23, %v3951_v50  ;;  %v3981_v55 = vadd.f32 %v3974_v33, %v3965_v5 }
 0x3ea   :  { %v3978_v14 = vadd.f32 %v3970_v13, %v3962_v6  ;;  %v4158_v3 = vadd.f32 %v4073_v4, %v3980_v22  ;;  %v4154_v11 = vadd.f32 %v4067_v2, %v3976_v10  ;;  %v4150_v36 = vadd.f32 %v5828_v15, %v3992_v37 }
 0x3eb   :  { %v3979_v18 = vadd.f32 %v3970_v13, %v3963_v43  ;;  %v4155_v25 = vadd.f32 %v4069_v46, %v3977_v20  ;;  %v4159_v42 = vadd.f32 %v4075_v57, %v3981_v55  ;;  %v4152_v47 = vadd.f32 %v5830_v29, %v3992_v37 }
 0x3ec   :  { %v4174_v24 = vmul.f32 0.70710677, %v4158_v3  ;;  %v4156_v40 = vadd.f32 %v4144_v48, %v3978_v14  ;;  %v3982_v54 = vadd.f32 %v3974_v33, %v3966_v17  ;;  %v3983_v53 = vadd.f32 %v3974_v33, %v3967_v41 }
 0x3ed   :  { %v4157_v56 = vadd.f32 %v4146_v19, %v3979_v18  ;;  %v4170_v32 = vmul.f32 0.70710677, %v4154_v11  ;;  %v4171_v30 = vmul.f32 0.70710677, %v4155_v25  ;;  %v4175_v21 = vmul.f32 0.70710677, %v4159_v42 }
 0x3ee   :  { %4604 = verf.f32 %v4174_v24  ;;  %v4172_v58 = vmul.f32 0.70710677, %v4156_v40  ;;  %v4160_v38 = vadd.f32 %v4150_v36, %v3982_v54  ;;  %v4161_v15 = vadd.f32 %v4152_v47, %v3983_v53 }
 0x3ef   :  { %v4173_v31 = vmul.f32 0.70710677, %v4157_v56  ;;  %4606 = verf.f32 %v4170_v32  ;;  %v4166_v0 = vmul.f32 0.5, %v4158_v3  ;;  %v4162_v13 = vmul.f32 0.5, %v4154_v11 }
 0x3f0   :  { %4608 = verf.f32 %v4171_v30  ;;  %v4176_v1 = vmul.f32 0.70710677, %v4160_v38  ;;  %v4177_v29 = vmul.f32 0.70710677, %v4161_v15  ;;  %v4163_v33 = vmul.f32 0.5, %v4155_v25 }
 0x3f1   :  { %4610 = verf.f32 %v4172_v58  ;;  %v4164_v27 = vmul.f32 0.5, %v4156_v40  ;;  %v4165_v52 = vmul.f32 0.5, %v4157_v56  ;;  %v4167_v61 = vmul.f32 0.5, %v4159_v42 }
 0x3f2   :  { %4612 = verf.f32 %v4173_v31  ;;  %v4168_v59 = vmul.f32 0.5, %v4160_v38  ;;  %v4169_v62 = vmul.f32 0.5, %v4161_v15 }
 0x3f3   :  { %4614 = verf.f32 %v4175_v21 }
 0x3f4   :  { %4616 = verf.f32 %v4176_v1 }
 0x3f5   :  { %4618 = verf.f32 %v4177_v29 }
 0x3f8   :  { %v4605_v28 = vpop.eup %4604 }
 0x3f9   :  { %v4607_v35 = vpop.eup %4606  ;;  %v4190_v63 = vadd.f32 1.0, %v4605_v28 }
 0x3fa   :  { %v4609_v26 = vpop.eup %4608  ;;  %v4186_v51 = vadd.f32 1.0, %v4607_v35 }
 0x3fb   :  { %v4611_v12 = vpop.eup %4610  ;;  %v4198_v23 = vmul.f32 %v4190_v63, %v4166_v0  ;;  %v4187_v8 = vadd.f32 1.0, %v4609_v26 }
 0x3fc   :  { %v4613_v37 = vpop.eup %4612  ;;  %v4188_v2 = vadd.f32 1.0, %v4611_v12  ;;  %v4194_v46 = vmul.f32 %v4186_v51, %v4162_v13 }
 0x3fd   :  { %v4615_v39 = vpop.eup %4614  ;;  %4206 = vst [vmem:[#allocation2 + $0x20] sm:$0xff] %v4198_v23  ;;  %v4189_v49 = vadd.f32 1.0, %v4613_v37  ;;  %v4195_v48 = vmul.f32 %v4187_v8, %v4163_v33 }
 0x3fe   :  { %v4617_v19 = vpop.eup %4616  ;;  %v4196_v34 = vmul.f32 %v4188_v2, %v4164_v27  ;;  %4202 = vst [vmem:[#allocation2] sm:$0xff] %v4194_v46  ;;  %v4191_v7 = vadd.f32 1.0, %v4615_v39 }
 0x3ff   :  { %v4619_v4 = vpop.eup %4618  ;;  %v4197_v57 = vmul.f32 %v4189_v49, %v4165_v52  ;;  %4203 = vst [vmem:[#allocation2 + $0x8] sm:$0xff] %v4195_v48  ;;  %v4192_v45 = vadd.f32 1.0, %v4617_v19 }
 0x400   :  { %4204 = vst [vmem:[#allocation2 + $0x10] sm:$0xff] %v4196_v34  ;;  %v4199_v60 = vmul.f32 %v4191_v7, %v4167_v61  ;;  %v4193_v9 = vadd.f32 1.0, %v4619_v4 }
 0x401   :  { %4205 = vst [vmem:[#allocation2 + $0x18] sm:$0xff] %v4197_v57  ;;  %v4200_v50 = vmul.f32 %v4192_v45, %v4168_v59 }
 0x402   :  { %4207 = vst [vmem:[#allocation2 + $0x28] sm:$0xff] %v4199_v60  ;;  %v4201_v16 = vmul.f32 %v4193_v9, %v4169_v62 }
 0x403   :  { %4208 = vst [vmem:[#allocation2 + $0x30] sm:$0xff] %v4200_v50 }
 0x404   :  { %4209 = vst [vmem:[#allocation2 + $0x38] sm:$0xff] %v4201_v16 }
 0x405   :  { %4637 = shalt.err (!%p4634_p4)
}
 0x406   :  { %s4638_s1 = scalar_lea.hbm %s5898_s6, 1024 }
 0x407   :  { %p4639_p5 = scmp.ne.s32.totalorder %s5898_s6, %s4638_s1  ;;  %p4642_p6 = scmp.lt.u32.totalorder %s4638_s1, %s5898_s6 }
 0x409   :  { %p4644_p7 = pnand %p4642_p6, %p4639_p5 }
 0x40b   :  { %4647 = shalt.err (!%p4644_p7)
}
 0x40c   :  { %s4667_s8 = smov 512   ;;  %s4668_s9 = smov 32  }
 0x40d   :  { %4221 = dma.vmem_to_hbm [thread:$0]  %s4216_s3, 1024, %s5898_s6, [#allocation3], %s4667_s8, %s4667_s8, %s4668_s9  }
 0x40e   :  { %4648 = dma.done.wait [#allocation3], 1024  }
 0x40f   :  { %4649 = vsyncadd [#allocation3], 4294966272 }
 0x410   :  { %4225 = vsyncpa [#allocation3], 1 }

</bundles_post_ra>
